<compile_context>
chip_gen: v6e
topology: v6e:2x2x1
jax: 0.10.0
libtpu: 0.0.40
codegen_flags: <defaults>
</compile_context>

<pallas_src>
import jax
import jax.numpy as jnp
from jax import lax
from jax.experimental import pallas as pl
from jax.experimental.pallas import tpu as pltpu

EPS = 1e-07  # matches the PyTorch module


# --------------------------------------------------------------------------
# Fused kernel: per node-tile (TN nodes x K dst-grouped edge slots)
#   hd_ref   : [3, TN*K, 2C] f32  (spatial, padded-edge, [h1 | d1] channels)
#   wcat_ref : [C, 2C] compute_dtype  ([w2 | w2@wdm] for the single MXU matmul)
#   out_ref  : [3, TN, C] f32
# --------------------------------------------------------------------------
def _fused_kernel(hd_ref, wcat_ref, out_ref):
    tk = hd_ref.shape[1]
    tn = out_ref.shape[1]
    c = out_ref.shape[2]
    k = tk // tn
    cdt = wcat_ref.dtype

    hd = hd_ref[...]                                    # [3, TK, 2C] f32
    h1 = hd[:, :, :c]                                   # [3, TK, C]
    d1 = hd[:, :, c:]                                   # [3, TK, C]

    # ---- VNLeakyReLU (negative_slope = 0): project out when <h, d> < 0.
    dot = jnp.sum(h1 * d1, axis=0)                      # [TK, C] f32 (VPU)
    dn = jnp.sum(d1 * d1, axis=0)                       # [TK, C] f32
    coef = dot * pl.reciprocal(dn + EPS, approx=True)   # divide on EUP slot
    h1r = jnp.where((dot >= 0.0)[None], h1, h1 - coef[None] * d1)

    # ---- Fused VNLinear(C->C) + map_to_dir(C->C): ONE merged-M MXU matmul.
    hc = jnp.dot(h1r.reshape(3 * tk, c).astype(cdt), wcat_ref[...],
                 preferred_element_type=jnp.float32)    # [3*TK, 2C] f32

    hc4 = hc.reshape(3, tn, k, 2 * c)                   # free view (k % 8 == 0)
    h2 = hc4[:, :, :, :c]                               # [3, TN, K, C]
    dm = hc4[:, :, :, c:]
    dp = jnp.sum(h2 * dm, axis=0)                       # [TN, K, C] f32

    # ---- per-node / per-channel argmax over K edge slots (lowest-k tie-break),
    #      then gather the matching h2 rows — all in-register.
    maxv = jnp.max(dp, axis=1, keepdims=True)           # [TN, 1, C]
    kio = lax.broadcasted_iota(jnp.int32, (tn, k, c), 1).astype(jnp.float32)
    argk = jnp.min(jnp.where(dp == maxv, kio, float(k)), axis=1, keepdims=True)
    sel = kio == argk                                    # [TN, K, C] one-hot
    out_ref[...] = jnp.sum(jnp.where(sel[None], h2, 0.0),
                           axis=2).astype(out_ref.dtype)  # [3, TN, C] single store


def _round_up(x, m):
    return (x + m - 1) // m * m


# --------------------------------------------------------------------------
# Wrapper: glue (sort by dst, pad to fixed fan-in K, layer-1 in XLA)
#          + fused pallas_call.
# --------------------------------------------------------------------------
def pointnet_conv_vn(x_vn, pos_vn, edge_index, params, *, fan_in=None,
                     tile_n=256, compute_dtype=jnp.bfloat16):
    """Fused forward; returns [N, C_out, 3] (PyTorch layout).

    Assumes at most `fan_in` incoming edges per node (edge_grasp's knn/ball
    graph has a uniform fan-in).  Padded edge slots replicate a node's last
    real edge, so the max aggregation is unchanged by padding.
    """
    hp = lax.Precision.HIGHEST
    w1t, wd1t, w2t, wdmt = params
    src = edge_index[0].astype(jnp.int32)
    dst = edge_index[1].astype(jnp.int32)
    n_nodes = pos_vn.shape[0]
    n_edges = src.shape[0]
    c_out = w1t.shape[1]

    k = fan_in if fan_in is not None else -(-n_edges // n_nodes)
    k = _round_up(max(int(k), 1), 8)   # sublane-aligned fan-in
    # TODO(synk): nodes with in-degree > fan_in get extra edges dropped; pass
    # fan_in >= max in-degree for general graphs.  Zero-in-degree nodes return
    # the h2 of a foreign edge (undefined/OOB in the torch path too).

    tn = min(_round_up(tile_n, 8), _round_up(n_nodes, 8))
    if _round_up(n_nodes, tn) // tn < 2 and n_nodes > 8:
        # split into >=2 grid steps so both v7x TensorCores get work
        tn = max(8, _round_up((n_nodes + 1) // 2, 8))
    n_pad = _round_up(n_nodes, tn)
    tk = tn * k

    # --- glue (XLA): sort edges by destination, pad every node to K slots ---
    order = jnp.argsort(dst, stable=True)
    sorted_dst = dst[order]
    node_ids = jnp.arange(n_pad, dtype=jnp.int32)
    starts = jnp.searchsorted(sorted_dst, node_ids).astype(jnp.int32)
    ends = jnp.searchsorted(sorted_dst, node_ids, side="right").astype(jnp.int32)
    counts = ends - starts
    kio = jnp.arange(k, dtype=jnp.int32)
    slot = jnp.minimum(kio[None, :], jnp.maximum(counts[:, None] - 1, 0))
    pos_sorted = jnp.clip(starts[:, None] + slot, 0, n_edges - 1)
    edge_id = order[pos_sorted]                                     # [N_pad, K]
    src_p = src[edge_id].reshape(-1)                                # [E_pad]
    dst_node = jnp.clip(node_ids, 0, n_nodes - 1)

    x_src = x_vn[src_p].astype(jnp.float32)                         # [E_pad, Fx, 3]
    rel = (pos_vn[src_p].astype(jnp.float32)
           - jnp.repeat(pos_vn[dst_node].astype(jnp.float32), k, axis=0))
    feat = jnp.concatenate([x_src, rel], axis=1)                    # [E_pad, Cin, 3]

    # --- layer 1 + its map_to_dir in XLA (Cin is tiny): lane-dense [3,E,2C] ---
    w1f = w1t.astype(jnp.float32)                                   # [Cin, C]
    w1d1 = jnp.dot(w1f, wd1t.astype(jnp.float32), precision=hp)     # [Cin, C]
    wcat1 = jnp.concatenate([w1f, w1d1], axis=1)                    # [Cin, 2C]
    hd = jnp.einsum("eid,io->deo", feat, wcat1, precision=hp)       # [3, E_pad, 2C]

    # --- layer 2 + its map_to_dir fused into one [C, 2C] MXU weight ---
    w2f = w2t.astype(jnp.float32)
    w2dm = jnp.dot(w2f, wdmt.astype(jnp.float32), precision=hp)
    wcat2 = jnp.concatenate([w2f, w2dm], axis=1).astype(compute_dtype)  # [C, 2C]

    out = pl.pallas_call(
        _fused_kernel,
        out_shape=jax.ShapeDtypeStruct((3, n_pad, c_out), jnp.float32),
        grid=(n_pad // tn,),
        in_specs=[
            pl.BlockSpec((3, tk, 2 * c_out), lambda i: (0, i, 0)),
            pl.BlockSpec((c_out, 2 * c_out), lambda i: (0, 0)),
        ],
        out_specs=pl.BlockSpec((3, tn, c_out), lambda i: (0, i, 0)),
        compiler_params=pltpu.CompilerParams(
            dimension_semantics=("parallel",),
            vmem_limit_bytes=32 * 1024 * 1024),
    )(hd, wcat2)

    out = out[:, :n_nodes, :]                                       # [3, N, C]
    return jnp.transpose(out, (1, 2, 0))                            # [N, C, 3]


# --------------------------------------------------------------------------
# Pure-JAX reference (mirrors the PyTorch math, high precision).
# Returns (out [N,C,3], gap [N,C]) where gap = margin between the top-2
# per-node/per-channel dot products (used to exclude numerically ambiguous
# argmax picks — tie-breaking is implementation-defined in torch_scatter).
# --------------------------------------------------------------------------
def ref_forward(x_vn, pos_vn, edge_index, params):
    w1t, wd1t, w2t, wdmt = params
    src, dst = edge_index[0], edge_index[1]
    n = pos_vn.shape[0]
    hp = lax.Precision.HIGHEST

    def vnlinear(x, wt):  # x: [E, Cin, 3], wt: [Cin, Cout] -> [E, Cout, 3]
        return jnp.einsum("io,eid->eod", wt, x, precision=hp)

    rel = pos_vn[src] - pos_vn[dst]
    x = jnp.concatenate([x_vn[src], rel], axis=1)              # [E, Cin, 3]
    x = vnlinear(x, w1t)                                       # [E, C, 3]
    d = vnlinear(x, wd1t)
    dot = jnp.sum(x * d, axis=2, keepdims=True)
    dn = jnp.sum(d * d, axis=2, keepdims=True)
    x = jnp.where(dot >= 0, x, x - dot / (dn + EPS) * d)       # negative_slope == 0
    x = vnlinear(x, w2t)                                       # [E, C, 3]
    dm = vnlinear(x, wdmt)
    dotp = jnp.sum(x * dm, axis=2)                             # [E, C]

    node_mask = dst[None, :] == jnp.arange(n)[:, None]         # [N, E]
    masked = jnp.where(node_mask[:, :, None], dotp[None], -jnp.inf)  # [N, E, C]
    arg = jnp.argmax(masked, axis=1)                           # [N, C]
    c = dotp.shape[1]
    out = x[arg, jnp.arange(c)[None, :], :]                    # [N, C, 3]
    top2 = lax.top_k(jnp.transpose(masked, (0, 2, 1)), 2)[0]   # [N, C, 2]
    gap = top2[..., 0] - top2[..., 1]
    return out, gap


# --------------------------------------------------------------------------
if __name__ == "__main__":
    key = jax.random.PRNGKey(0)
    kx, kp, ks, k1, k2, k3, k4 = jax.random.split(key, 7)

    N = 16          # nodes
    K = 8           # incoming edges per node (uniform fan-in, like a knn graph)
    E = N * K       # 128 edges
    CIN = 2
    COUT = 64

    x_vn = jax.random.normal(kx, (N, 1, 3), dtype=jnp.float32)
    pos_vn = jax.random.normal(kp, (N, 1, 3), dtype=jnp.float32)
    dst = jnp.repeat(jnp.arange(N, dtype=jnp.int32), K)
    src = jax.random.randint(ks, (E,), 0, N, dtype=jnp.int32)
    # shuffle the edge order so the dst-sorting glue is actually exercised
    perm = jax.random.permutation(jax.random.PRNGKey(1), E)
    edge_index = jnp.stack([src[perm], dst[perm]], axis=0)        # [2, E]

    # torch Linear weight is [out, in]; stored transposed as [in, out].
    def init_w(kk, fi, fo):
        bound = 1.0 / jnp.sqrt(jnp.float32(fi))
        return jax.random.uniform(kk, (fi, fo), jnp.float32,
                                  minval=-bound, maxval=bound)

    params = (init_w(k1, CIN, COUT), init_w(k2, COUT, COUT),
              init_w(k3, COUT, COUT), init_w(k4, COUT, COUT))

    ref, gap = ref_forward(x_vn, pos_vn, edge_index, params)

    def masked_err(out_, gap_thresh):
        unambig = gap > gap_thresh                                # [N, C]
        err = jnp.where(unambig[..., None], jnp.abs(out_ - ref), 0.0)
        return float(jnp.max(err)), float(jnp.mean(unambig))

    # f32 compute path — checked on argmax-unambiguous entries.
    out_f32 = pointnet_conv_vn(x_vn, pos_vn, edge_index, params, fan_in=K,
                               compute_dtype=jnp.float32)
    out_f32 = jax.block_until_ready(out_f32)
    err32, frac32 = masked_err(out_f32, 2e-2)
    ok32 = out_f32.shape == (N, COUT, 3) and err32 < 3e-2 and frac32 > 0.4

    # bf16 MXU path (default; v6e/v7x fast path) — looser check (tie-breaks may shift).
    out_bf16 = pointnet_conv_vn(x_vn, pos_vn, edge_index, params, fan_in=K)
    out_bf16 = jax.block_until_ready(out_bf16)
    err16, frac16 = masked_err(out_bf16, 3e-2)
    ok16 = (out_bf16.shape == (N, COUT, 3)
            and bool(jnp.all(jnp.isfinite(out_bf16)))
            and err16 < 1e-1 and frac16 > 0.25)

    if not (ok32 and ok16):
        raise AssertionError(
            f"mismatch: f32 err={err32:.4g} frac={frac32:.3f} "
            f"bf16 err={err16:.4g} frac={frac16:.3f}")
    print("KERNEL_OK")
</pallas_src>

<mosaic_0001>
module attributes {stable_mosaic.version = 11 : i64} {
  func.func @_fused_kernel(%arg0: i32, %arg1: memref<3x64x128xf32, #tpu.memory_space<vmem>>, %arg2: memref<64x128xf32, #tpu.memory_space<vmem>>, %arg3: memref<3x8x64xf32, #tpu.memory_space<vmem>>) attributes {dimension_semantics = [#tpu.dimension_semantics<parallel>], iteration_bounds = array<i64: 2>, scalar_prefetch = 0 : i64, scratch_operands = 0 : i64, tpu.core_type = #tpu.core_type<tc>, window_params = [{transform_indices = @transform_0, window_bounds = array<i64: 3, 64, 128>}, {pipeline_mode = #tpu.pipeline_mode<synchronous>, transform_indices = @transform_1, window_bounds = array<i64: 64, 128>}, {transform_indices = @transform_2, window_bounds = array<i64: 3, 8, 64>}]} {
    %c0 = arith.constant 0 : index
    %c0_0 = arith.constant 0 : index
    %c0_1 = arith.constant 0 : index
    %0 = vector.load %arg1[%c0, %c0_0, %c0_1] : memref<3x64x128xf32, #tpu.memory_space<vmem>>, vector<3x64x128xf32>
    %1 = vector.extract_strided_slice %0 {offsets = [0, 0, 0], sizes = [3, 64, 64], strides = [1, 1, 1]} : vector<3x64x128xf32> to vector<3x64x64xf32>
    %2 = vector.extract_strided_slice %0 {offsets = [0, 0, 64], sizes = [3, 64, 64], strides = [1, 1, 1]} : vector<3x64x128xf32> to vector<3x64x64xf32>
    %3 = arith.mulf %1, %2 : vector<3x64x64xf32>
    %cst = arith.constant dense<0.000000e+00> : vector<64x64xf32>
    %4 = vector.multi_reduction <add>, %3, %cst [0] : vector<3x64x64xf32> to vector<64x64xf32>
    %5 = arith.mulf %2, %2 : vector<3x64x64xf32>
    %cst_2 = arith.constant dense<0.000000e+00> : vector<64x64xf32>
    %6 = vector.multi_reduction <add>, %5, %cst_2 [0] : vector<3x64x64xf32> to vector<64x64xf32>
    %cst_3 = arith.constant 1.000000e-07 : f32
    %7 = vector.broadcast %cst_3 : f32 to vector<64x64xf32>
    %8 = arith.addf %6, %7 : vector<64x64xf32>
    %9 = tpu.reciprocal %8 {approx = true} : vector<64x64xf32> -> vector<64x64xf32>
    %10 = arith.mulf %4, %9 : vector<64x64xf32>
    %cst_4 = arith.constant 0.000000e+00 : f32
    %11 = vector.broadcast %cst_4 : f32 to vector<64x64xf32>
    %12 = arith.cmpf oge, %4, %11 : vector<64x64xf32>
    %13 = vector.shape_cast %12 : vector<64x64xi1> to vector<1x64x64xi1>
    %14 = vector.shape_cast %10 : vector<64x64xf32> to vector<1x64x64xf32>
    %15 = vector.broadcast %14 : vector<1x64x64xf32> to vector<3x64x64xf32>
    %16 = arith.mulf %15, %2 : vector<3x64x64xf32>
    %17 = arith.subf %1, %16 : vector<3x64x64xf32>
    %18 = vector.shape_cast %13 : vector<1x64x64xi1> to vector<1x64x64xi1>
    %19 = vector.broadcast %18 : vector<1x64x64xi1> to vector<3x64x64xi1>
    %20 = arith.select %19, %1, %17 : vector<3x64x64xi1>, vector<3x64x64xf32>
    %21 = vector.shape_cast %20 : vector<3x64x64xf32> to vector<192x64xf32>
    %c0_5 = arith.constant 0 : index
    %c0_6 = arith.constant 0 : index
    %22 = vector.load %arg2[%c0_5, %c0_6] : memref<64x128xf32, #tpu.memory_space<vmem>>, vector<64x128xf32>
    %cst_7 = arith.constant dense<0.000000e+00> : vector<192x128xf32>
    %23 = tpu.matmul %21, %22, %cst_7 {dimension_numbers = #tpu.dot_dimension_numbers<[1], [0], [0], [1], [0, 0, 1, 1], [], []>} : vector<192x64xf32>, vector<64x128xf32>, vector<192x128xf32> -> vector<192x128xf32>
    %24 = vector.shape_cast %23 : vector<192x128xf32> to vector<3x8x8x128xf32>
    %25 = vector.extract_strided_slice %24 {offsets = [0, 0, 0, 0], sizes = [3, 8, 8, 64], strides = [1, 1, 1, 1]} : vector<3x8x8x128xf32> to vector<3x8x8x64xf32>
    %26 = vector.extract_strided_slice %24 {offsets = [0, 0, 0, 64], sizes = [3, 8, 8, 64], strides = [1, 1, 1, 1]} : vector<3x8x8x128xf32> to vector<3x8x8x64xf32>
    %27 = arith.mulf %25, %26 : vector<3x8x8x64xf32>
    %cst_8 = arith.constant dense<0.000000e+00> : vector<8x8x64xf32>
    %28 = vector.multi_reduction <add>, %27, %cst_8 [0] : vector<3x8x8x64xf32> to vector<8x8x64xf32>
    %cst_9 = arith.constant dense<0xFF800000> : vector<8x64xf32>
    %29 = vector.multi_reduction <maximumf>, %28, %cst_9 [1] : vector<8x8x64xf32> to vector<8x64xf32>
    %30 = vector.shape_cast %29 : vector<8x64xf32> to vector<8x1x64xf32>
    %31 = tpu.iota {dimensions = array<i32: 1>} : vector<8x8x64xi32>
    %32 = arith.sitofp %31 : vector<8x8x64xi32> to vector<8x8x64xf32>
    %33 = vector.broadcast %30 : vector<8x1x64xf32> to vector<8x8x64xf32>
    %34 = arith.cmpf oeq, %28, %33 : vector<8x8x64xf32>
    %cst_10 = arith.constant 8.000000e+00 : f32
    %35 = vector.broadcast %cst_10 : f32 to vector<8x8x64xf32>
    %36 = arith.select %34, %32, %35 : vector<8x8x64xi1>, vector<8x8x64xf32>
    %cst_11 = arith.constant dense<0x7F800000> : vector<8x64xf32>
    %37 = vector.multi_reduction <minimumf>, %36, %cst_11 [1] : vector<8x8x64xf32> to vector<8x64xf32>
    %38 = vector.shape_cast %37 : vector<8x64xf32> to vector<8x1x64xf32>
    %39 = vector.broadcast %38 : vector<8x1x64xf32> to vector<8x8x64xf32>
    %40 = arith.cmpf oeq, %32, %39 : vector<8x8x64xf32>
    %41 = vector.shape_cast %40 : vector<8x8x64xi1> to vector<1x8x8x64xi1>
    %cst_12 = arith.constant 0.000000e+00 : f32
    %42 = vector.shape_cast %41 : vector<1x8x8x64xi1> to vector<1x8x8x64xi1>
    %43 = vector.broadcast %42 : vector<1x8x8x64xi1> to vector<3x8x8x64xi1>
    %44 = vector.broadcast %cst_12 : f32 to vector<3x8x8x64xf32>
    %45 = arith.select %43, %25, %44 : vector<3x8x8x64xi1>, vector<3x8x8x64xf32>
    %cst_13 = arith.constant dense<0.000000e+00> : vector<3x8x64xf32>
    %46 = vector.multi_reduction <add>, %45, %cst_13 [2] : vector<3x8x8x64xf32> to vector<3x8x64xf32>
    %c0_14 = arith.constant 0 : index
    %c0_15 = arith.constant 0 : index
    %c0_16 = arith.constant 0 : index
    %47 = vector.load %arg3[%c0_14, %c0_15, %c0_16] : memref<3x8x64xf32, #tpu.memory_space<vmem>>, vector<3x8x64xf32>
    tpu.vector_store %arg3[%c0_14, %c0_15, %c0_16], %46 {strides = array<i32>} : memref<3x8x64xf32, #tpu.memory_space<vmem>>, vector<3x8x64xf32>,
    return
  }
  func.func @transform_0(%arg0: i32) -> (i32, i32, i32) {
    %c0_i32 = arith.constant 0 : i32
    %c0_i32_0 = arith.constant 0 : i32
    %c0_i32_1 = arith.constant 0 : i32
    return %c0_i32, %arg0, %c0_i32_0 : i32, i32, i32
  }
  func.func @transform_1(%arg0: i32) -> (i32, i32) {
    %c0_i32 = arith.constant 0 : i32
    %c0_i32_0 = arith.constant 0 : i32
    %c0_i32_1 = arith.constant 0 : i32
    return %c0_i32, %c0_i32_0 : i32, i32
  }
  func.func @transform_2(%arg0: i32) -> (i32, i32, i32) {
    %c0_i32 = arith.constant 0 : i32
    %c0_i32_0 = arith.constant 0 : i32
    %c0_i32_1 = arith.constant 0 : i32
    return %c0_i32, %arg0, %c0_i32_0 : i32, i32, i32
  }
}

</mosaic_0001>

<bundles_post_ra>
// kernel: tpu_custom_call.1
= control target key start
LH: loop header
LB: loop body
LE: loop exit
PB: predicated region body
PF: predicated region fallthrough
CT: control target
= control target key end

     0   :  { %7 = vsyncpa [#allocation3], 0  ;;  %s2904_s0 = inlined_call_operand.hbm [shape: f32[3,128,128], index: 0, kind: input, shape index: {}]   ;;  %s2905_s1 = inlined_call_operand.hbm [shape: f32[64,128], index: 1, kind: input, shape index: {}]   ;;  %s2906_s2 = inlined_call_operand.hbm [shape: f32[3,16,64], index: 2, kind: output, shape index: {}]  }
   0x1   :  { %9 = vsyncpa [#allocation3 + $0x1], 0 }
   0x2   :  { %10 = vsyncpa [#allocation6], 0 }
   0x3   :  { %11 = vsyncpa [#allocation4], 0 }
   0x4   :  { %13 = vsyncpa [#allocation4 + $0x1], 0  ;;  %s1882_s9 = smov 0   ;;  %s1884_s10 = smov 0  }
   0x5   :  { %s1886_s11 = smov 0   ;;  %s1888_s12 = smov 0  }
   0x6 LB: > { %s1903_s13 = sadd.s32 4294967295, %s1852_s12   ;;  %s1531_s14 = sadd.s32 4294967294, %s1852_s12   ;;  %s1852_s12 = sphi %s1888_s12, %s2946_s12   ;;  %s1848_s11 = sphi %s1886_s11, %s2945_s11   ;;  %s1844_s10 = sphi %s1884_s10, %s2944_s10   ;;  %s1840_s9 = sphi %s1882_s9, %s2943_s9  }
   0x7   : > { %s1907_s15 = sadd.s32 1, %s1852_s12   ;;  %s26_s16 = sadd.s32 1, %s1848_s11 }
   0x8   : > { %s23_s17 = ssub.s32 %s1852_s12, %s1907_s15  ;;  %p33_p0 = scmp.ne.s32.totalorder %s1848_s11, %s1844_s10 }
   0x9   : > { %p24_p1 = scmp.eq.s32.totalorder %s23_s17, 0  ;;  %p34_p2 = scmp.eq.s32.totalorder %s1852_s12, 0 }
   0xa   : > { %p39_p3 = scmp.ne.s32.totalorder %s1844_s10, %s1840_s9  ;;  %p40_p4 = scmp.eq.s32.totalorder %s1903_s13, 0 }
   0xb   : > { %s1919_s18 = scalar_select %p24_p1, %s1848_s11, %s26_s16  }
   0xc   : > { %p1921_p5 = por %p34_p2, %p33_p0  ;;  %p1927_p6 = por %p40_p4, %p39_p3 }
   0xd   : > { %p84_p7 = scmp.eq.s32.totalorder %s1903_s13, 1  ;;  %p90_p8 = scmp.eq.s32.totalorder %s1531_s14, 1 }
   0xe   : > { %s2922_s20 = scalar_select %p1927_p6, 1, 0 }
   0xf   : > { %p1532_p9 = scmp.ge.s32.totalorder %s1852_s12, 1  ;;  %p97_p10 = scmp.lt.s32.totalorder %s1852_s12, 3 }
  0x10   : > { %p1934_p11 = por %p84_p7, %p33_p0  ;;  %p1938_p12 = por %p90_p8, %p39_p3 }
  0x11   : > { %p1942_p13 = pnand %p1532_p9, %p97_p10  ;;  %s1854_s24 = smov [#allocation5]  }
  0x12   : > { %s2923_s21 = scalar_select %p1934_p11, 1, 0 }
  0x13   : > { %s2924_s22 = scalar_select %p1938_p12, 1, 0 }
  0x14   : > { %p1687_p1 = pneg %p1942_p13  ;;  %s109_s25 = sshll.u32 %s1854_s24, 4  ;;  %s110_s25 = int_to_ptr.vmem [resolvable:$true] %s109_s25 }
  0x15   : > { %s1769_s26 = scalar_lea.vmem %s110_s25, 1024  ;;  %p1777_p8 = scmp.lt.s32.totalorder %s110_s25, %s110_s25 }
  0x16   : > { %p1688_p2 = pnand %p1687_p1, %p40_p4  ;;  %p1770_p7 = scmp.ne.s32.totalorder %s110_s25, %s1769_s26 }
  0x17   : > { %p1778_p6 = scmp.lt.s32.totalorder %s1769_s26, %s1769_s26 }
  0x18   : > { %p1760_p0 = pneg %p1688_p2 }
  0x19   : > { %p1779_p12 = por %p1778_p6, %p1777_p8 }
  0x1a   : > { %p1772_p11 = pnand %p1770_p7, %p1760_p0 }
  0x1c   : > { %p1773_p3 = pneg %p1772_p11 }
  0x1e   : > { %p1780_p9 = pnand %p1779_p12, %p1773_p3 }
  0x20   : > { %1783 = shalt.err (!%p1780_p9)
}
  0x21   : > { %s1855_s27 = smov 128   ;;  %s1856_s28 = smov 8  }
  0x22   : > { %1690 = dma.hbm_to_vmem [thread:$0]  (!%p1688_p2), %s2905_s1, 1024, %s110_s25, [#allocation6], %s1855_s27, %s1855_s27, %s1856_s28  }
  0x23   : > { %p1534_p10 = scmp.ge.s32.totalorder %s1852_s12, 2 }
  0x25   : > { %119 = sbr.rel (%p1534_p10) target bundleno = 56 (0x38), region = 20 }
  0x2a   : > { %s123_s3 = sand.u32 1, %s1848_s11   ;;  %s1568_s5 = sshll.u32 %s1852_s12, 10 }
  0x2b   : > { %s1669_s4 = smul.u32 192, %s123_s3  ;;  %s1857_s6 = smov 2048  }
  0x2c   : > { %1675 = sst [smem:[#allocation9]] (%p1921_p5), %s1857_s6  ;;  %s1858_s17 = smov 1024  }
  0x2d   : > { %s1674_s7 = scalar_select %p1921_p5, [#allocation0], [#allocation10] }
  0x2e   : > { %s127_s14 = scalar_lea.vmem [#allocation2], %s1669_s4  ;;  %1676 = sst [smem:[#allocation9 + $0x1]] (%p1921_p5), %s1858_s17 }
  0x2f   : > { %s138_s8 = sld [smem:[%s1674_s7]]   ;;  %s146_s16 = sshll.u32 %s127_s14, 4  ;;  %s147_s16 = int_to_ptr.vmem [resolvable:$true] %s146_s16 }
  0x30   : > { %s1859_s24 = smov 8   ;;  %s133_s27 = scalar_lea.hbm %s2904_s0, %s1568_s5 }
  0x31   : > { %1677 = sst [smem:[#allocation9 + $0x2]] (%p1921_p5), %s1859_s24  ;;  %s1860_s28 = smov 128  }
  0x32   : > { %1678 = sst [smem:[#allocation9 + $0x3]] (%p1921_p5), %s1860_s28  ;;  %s124_s4 = scalar_lea.sflag [#allocation3], %s123_s3 }
  0x33   : > { %1679 = sst [smem:[#allocation9 + $0x4]] (%p1921_p5), %s1860_s28  ;;  %s1861_s6 = smov 131072  }
  0x34   : > { %1680 = sst [smem:[#allocation9 + $0x5]] (%p1921_p5), %s1859_s24 }
  0x35   : > { %s1537_s29 = sshll.u32 %s138_s8, 26 }
  0x36   : > { %s1538_s30 = sadd.s32 134217728, %s1537_s29 }
  0x37   : > { %1681 = dma.general (%p1921_p5), %s133_s27, 3072, %s147_s16, %s124_s4, %s1861_s6, [#allocation9], %s1538_s30, 0  }
  0x38 PF: > { %171 = sbr.rel (%p1942_p13) target bundleno = 708 (0x2c4), region = 28 }
  0x3d   : > { %s1980_s5 = sand.u32 1, %s1844_s10   ;;  %p2926_p6 = scmp.ne.s32.totalorder %s2922_s20, 0 }
  0x3e   : > { %s1670_s7 = smul.u32 192, %s1980_s5  ;;  %s174_s14 = scalar_lea.sflag [#allocation3], %s1980_s5 }
  0x40   : > { %s1984_s17 = scalar_lea.vmem [#allocation2], %s1670_s7 }
  0x41   : > { %1827 = dma.done.wait (%p2926_p6), %s174_s14, 3072  }
  0x42   : > { %1829 = vsyncadd (%p2926_p6), %s174_s14, 4294964224 }
  0x43   : > { %1831 = dma.done.wait (%p40_p4), [#allocation6], 1024  }
  0x44   : > { %1833 = vsyncadd (%p40_p4), [#allocation6], 4294966272  ;;  %v1995_v0 = vld [vmem:[%s1984_s17 + $0x8] sm:$0xff]  ;;  %vm412_vm0 = vcmask 1048064   ;;  %v1998_v1 = vld [vmem:[%s1984_s17] sm:$0xff]  ;;  %s1862_s19 = smov 64  }
  0x45   : > { %253 = vrot.lane.b32.xlu1 %v1995_v0, %s1862_s19  ;;  %251 = vrot.lane.b32.xlu0 %v1998_v1, %s1862_s19  ;;  %v388_v2 = vmul.f32 %v1998_v1, %v1998_v1  ;;  %v2007_v3 = vld [vmem:[%s1984_s17 + $0x48] sm:$0xff]  ;;  %v2010_v4 = vld [vmem:[%s1984_s17 + $0x40] sm:$0xff]  ;;  %v389_v5 = vmul.f32 %v1995_v0, %v1995_v0  ;;  %v612_v29 = vld [vmem:[#allocation5 + $0x38] sm:$0xff]  ;;  %vm347_vm1 = vcmask 523264   ;;  %s1671_s20 = smul.u32 24, %s1980_s5  ;;  %s1565_s23 = sshll.u32 %s1903_s13, 7 }
  0x46   : > { %v397_v6 = vmul.f32 %v2007_v3, %v2007_v3  ;;  %v396_v7 = vmul.f32 %v2010_v4, %v2010_v4  ;;  %v2019_v8 = vld [vmem:[%s1984_s17 + $0x80] sm:$0xff]  ;;  %v2030_v13 = vld [vmem:[%s1984_s17 + $0x88] sm:$0xff]  ;;  %v2043_v21 = vld [vmem:[%s1984_s17 + $0x50] sm:$0xff]  ;;  %1601 = vmatprep.subr.mxu0 %v612_v29  ;;  %1653 = vmatprep.subr.mxu1 %v612_v29  ;;  %s2856_s13 = scalar_lea.hbm %s2906_s2, %s1565_s23  ;;  %s1436_s25 = scalar_lea.sflag [#allocation4], %s1980_s5 }
  0x47   : > { %v413_v9 = vsel %vm412_vm0, %v388_v2, 0.0  ;;  %v404_v10 = vmul.f32 %v2019_v8, %v2019_v8  ;;  %v418_v14 = vsel %vm412_vm0, %v389_v5, 0.0  ;;  %v405_v16 = vmul.f32 %v2030_v13, %v2030_v13  ;;  %v2046_v22 = vld [vmem:[%s1984_s17 + $0x10] sm:$0xff]  ;;  %v2057_v27 = vld [vmem:[%s1984_s17 + $0x58] sm:$0xff]  ;;  %1602 = vmatpush3.msra.mxu0 %v612_v29  ;;  %1661 = vmatpush3.msra.mxu1 %v612_v29  ;;  %v2076_v37 = vld [vmem:[%s1984_s17 + $0x60] sm:$0xff]  ;;  %s201_s3 = scalar_lea.vmem [#allocation7], %s1671_s20 }
  0x48   : > { %v414_v11 = vsel %vm412_vm0, %v396_v7, 0.0  ;;  %v419_v15 = vsel %vm412_vm0, %v397_v6, 0.0  ;;  %v398_v25 = vmul.f32 %v2043_v21, %v2043_v21  ;;  %v390_v26 = vmul.f32 %v2046_v22, %v2046_v22  ;;  %2927 = vst [vmem:[#allocation14_spill] sm:$0xff] %v2057_v27  ;;  %v2060_v28 = vld [vmem:[%s1984_s17 + $0x18] sm:$0xff]  ;;  %v611_v32 = vld [vmem:[#allocation5 + $0x30] sm:$0xff]  ;;  %v2079_v38 = vld [vmem:[%s1984_s17 + $0x20] sm:$0xff] }
  0x49   : > { %269 = vrot.lane.b32.xlu1 %v2007_v3, %s1862_s19  ;;  %267 = vrot.lane.b32.xlu0 %v2010_v4, %s1862_s19  ;;  %v415_v12 = vadd.f32 %v414_v11, %v413_v9  ;;  %v416_v17 = vsel %vm412_vm0, %v404_v10, 0.0  ;;  %v420_v18 = vadd.f32 %v419_v15, %v418_v14  ;;  %v421_v20 = vsel %vm412_vm0, %v405_v16, 0.0  ;;  %v2071_v34 = vld [vmem:[%s1984_s17 + $0x90] sm:$0xff]  ;;  %v610_v40 = vld [vmem:[#allocation5 + $0x28] sm:$0xff]  ;;  %v2090_v44 = vld [vmem:[%s1984_s17 + $0x98] sm:$0xff]  ;;  %s1448_s8 = sshll.u32 %s201_s3, 4  ;;  %s2858_s8 = int_to_ptr.vmem [resolvable:$true] %s1448_s8 }
  0x4a   : > { %v399_v30 = vmul.f32 %v2057_v27, %v2057_v27  ;;  %v391_v31 = vmul.f32 %v2060_v28, %v2060_v28  ;;  %v424_v35 = vsel %vm412_vm0, %v398_v25, 0.0  ;;  %v423_v36 = vsel %vm412_vm0, %v390_v26, 0.0  ;;  %1603 = vmatprep.subr.mxu0 %v611_v32  ;;  %1654 = vmatprep.subr.mxu1 %v611_v32  ;;  %v2087_v43 = vld [vmem:[%s1984_s17 + $0x28] sm:$0xff]  ;;  %2928 = vst [vmem:[#allocation15_spill] sm:$0xff] %v2090_v44  ;;  %v609_v50 = vld [vmem:[#allocation5 + $0x20] sm:$0xff]  ;;  %v2116_v56 = vld [vmem:[%s1984_s17 + $0x70] sm:$0xff] }
  0x4b   : > { %v417_v19 = vadd.f32 %v416_v17, %v415_v12  ;;  %v422_v23 = vadd.f32 %v421_v20, %v420_v18  ;;  %v406_v39 = vmul.f32 %v2071_v34, %v2071_v34  ;;  %v400_v42 = vmul.f32 %v2076_v37, %v2076_v37  ;;  %1604 = vmatpush3.msra.mxu0 %v611_v32  ;;  %v2100_v49 = vld [vmem:[%s1984_s17 + $0x68] sm:$0xff]  ;;  %v2109_v53 = vld [vmem:[%s1984_s17 + $0xa0] sm:$0xff]  ;;  %v2119_v57 = vld [vmem:[%s1984_s17 + $0x30] sm:$0xff]  ;;  %s1784_s26 = scalar_lea.vmem %s2858_s8, 384  ;;  %p2941_p5 = scmp.ne.s32.totalorder %s2923_s21, 0 }
  0x4c   : > { %v429_v41 = vsel %vm412_vm0, %v399_v30, 0.0  ;;  %1662 = vmatpush3.msra.mxu1 %v611_v32  ;;  %v428_v45 = vsel %vm412_vm0, %v391_v31, 0.0  ;;  %v392_v46 = vmul.f32 %v2079_v38, %v2079_v38  ;;  %v393_v47 = vmul.f32 %v2087_v43, %v2087_v43  ;;  %1605 = vmatprep.subr.mxu0 %v610_v40  ;;  %2929 = vst [vmem:[#allocation16_spill] sm:$0xff] %v2109_v53  ;;  %v2113_v55 = vld [vmem:[%s1984_s17 + $0xa8] sm:$0xff]  ;;  %v2123_v60 = vld [vmem:[%s1984_s17 + $0x78] sm:$0xff]  ;;  %v607_v12 = vld [vmem:[#allocation5 + $0x10] sm:$0xff]  ;;  %p1785_p4 = scmp.ne.s32.totalorder %s2858_s8, %s1784_s26 }
  0x4d   : > { %285 = vrot.lane.b32.xlu1 %v2030_v13, %s1862_s19  ;;  %283 = vrot.lane.b32.xlu0 %v2019_v8, %s1862_s19  ;;  %v453_v24 = vadd.f32 1e-07, %v417_v19  ;;  %v454_v33 = vadd.f32 1e-07, %v422_v23  ;;  %v407_v48 = vmul.f32 %v2090_v44, %v2090_v44  ;;  %v425_v51 = vadd.f32 %v424_v35, %v423_v36  ;;  %2930 = vst [vmem:[#allocation17_spill] sm:$0xff] %v2113_v55  ;;  %v2126_v61 = vld [vmem:[%s1984_s17 + $0x38] sm:$0xff] }
  0x4e   : > { %1655 = vmatprep.subr.mxu1 %v610_v40  ;;  %v401_v52 = vmul.f32 %v2100_v49, %v2100_v49  ;;  %v426_v54 = vsel %vm412_vm0, %v406_v39, 0.0  ;;  %1606 = vmatpush3.msra.mxu0 %v610_v40  ;;  %v430_v58 = vadd.f32 %v429_v41, %v428_v45  ;;  %v434_v59 = vsel %vm412_vm0, %v400_v42, 0.0  ;;  %v608_v62 = vld [vmem:[#allocation5 + $0x18] sm:$0xff]  ;;  %v2149_v17 = vld [vmem:[%s1984_s17 + $0xb0] sm:$0xff]  ;;  %v606_v25 = vld [vmem:[#allocation5 + $0x8] sm:$0xff]  ;;  %p1786_p11 = pnand %p1785_p4, %p2941_p5  ;;  %s1863_s27 = smov [#allocation7]  }
  0x4f   : > { %1742 = vrcp.f32 %v453_v24  ;;  %1663 = vmatpush3.msra.mxu1 %v610_v40  ;;  %1607 = vmatprep.subr.mxu0 %v609_v50  ;;  %v433_v63 = vsel %vm412_vm0, %v392_v46, 0.0  ;;  %v438_v2 = vsel %vm412_vm0, %v393_v47, 0.0  ;;  %v431_v5 = vsel %vm412_vm0, %v407_v48, 0.0  ;;  %v2152_v18 = vld [vmem:[%s1984_s17 + $0xb8] sm:$0xff]  ;;  %v605_v40 = vld [vmem:[#allocation5] sm:$0xff]  ;;  %s1788_s28 = sshll.u32 %s1863_s27, 4  ;;  %s1789_s28 = int_to_ptr.vmem [resolvable:$false] %s1788_s28 }
  0x50   : > { %1744 = vrcp.f32 %v454_v33  ;;  %1656 = vmatprep.subr.mxu1 %v609_v50  ;;  %v408_v6 = vmul.f32 %v2109_v53, %v2109_v53  ;;  %1608 = vmatpush3.msra.mxu0 %v609_v50  ;;  %v427_v7 = vadd.f32 %v426_v54, %v425_v51  ;;  %v439_v9 = vsel %vm412_vm0, %v401_v52, 0.0  ;;  %p1787_p12 = pneg %p1786_p11  ;;  %s1790_s29 = scalar_lea.vmem %s1789_s28, 768 }
  0x51   : > { %271 = vrot.lane.b32.xlu1 %v2043_v21, %s1862_s19  ;;  %255 = vrot.lane.b32.xlu0 %v2046_v22, %s1862_s19  ;;  %v402_v10 = vmul.f32 %v2116_v56, %v2116_v56  ;;  %v394_v11 = vmul.f32 %v2119_v57, %v2119_v57  ;;  %v409_v14 = vmul.f32 %v2113_v55, %v2113_v55  ;;  %p1791_p13 = scmp.lt.s32.totalorder %s2858_s8, %s1789_s28  ;;  %p1792_p1 = scmp.lt.s32.totalorder %s1790_s29, %s1784_s26 }
  0x52   : > { %1664 = vmatpush3.msra.mxu1 %v609_v50  ;;  %v403_v15 = vmul.f32 %v2123_v60, %v2123_v60  ;;  %v395_v16 = vmul.f32 %v2126_v61, %v2126_v61  ;;  %1609 = vmatprep.subr.mxu0 %v608_v62  ;;  %v435_v19 = vadd.f32 %v434_v59, %v433_v63  ;;  %v436_v24 = vsel %vm412_vm0, %v408_v6, 0.0 }
  0x53   : > { %1657 = vmatprep.subr.mxu1 %v608_v62  ;;  %1610 = vmatpush3.msra.mxu0 %v608_v62  ;;  %v432_v20 = vadd.f32 %v431_v5, %v430_v58  ;;  %v440_v23 = vadd.f32 %v439_v9, %v438_v2  ;;  %v455_v26 = vadd.f32 1e-07, %v427_v7  ;;  %v444_v29 = vsel %vm412_vm0, %v402_v10, 0.0  ;;  %p1793_p2 = por %p1792_p1, %p1791_p13 }
  0x54   : > { %1665 = vmatpush3.msra.mxu1 %v608_v62  ;;  %1611 = vmatprep.subr.mxu0 %v607_v12  ;;  %v443_v30 = vsel %vm412_vm0, %v394_v11, 0.0  ;;  %v410_v31 = vmul.f32 %v2149_v17, %v2149_v17  ;;  %v441_v33 = vsel %vm412_vm0, %v409_v14, 0.0  ;;  %v449_v35 = vsel %vm412_vm0, %v403_v15, 0.0 }
  0x55   : > { %273 = vrot.lane.b32.xlu1 %v2057_v27, %s1862_s19  ;;  %257 = vrot.lane.b32.xlu0 %v2060_v28, %s1862_s19  ;;  %v448_v36 = vsel %vm412_vm0, %v395_v16, 0.0  ;;  %v411_v39 = vmul.f32 %v2152_v18, %v2152_v18  ;;  %v456_v41 = vadd.f32 1e-07, %v432_v20  ;;  %v437_v42 = vadd.f32 %v436_v24, %v435_v19  ;;  %p1794_p0 = pnand %p1793_p2, %p1787_p12 }
  0x56   : > { %1658 = vmatprep.subr.mxu1 %v607_v12  ;;  %1612 = vmatpush3.msra.mxu0 %v607_v12  ;;  %v445_v45 = vadd.f32 %v444_v29, %v443_v30  ;;  %1746 = vrcp.f32 %v455_v26  ;;  %v442_v46 = vadd.f32 %v441_v33, %v440_v23  ;;  %v450_v47 = vadd.f32 %v449_v35, %v448_v36 }
  0x57   : > { %1666 = vmatpush3.msra.mxu1 %v607_v12  ;;  %1613 = vmatprep.subr.mxu0 %v606_v25  ;;  %v446_v48 = vsel %vm412_vm0, %v410_v31, 0.0  ;;  %v451_v51 = vsel %vm412_vm0, %v411_v39, 0.0  ;;  %v457_v52 = vadd.f32 1e-07, %v437_v42  ;;  %1748 = vrcp.f32 %v456_v41 }
  0x58   : > { %1659 = vmatprep.subr.mxu1 %v606_v25  ;;  %1614 = vmatpush3.msra.mxu0 %v606_v25  ;;  %v447_v54 = vadd.f32 %v446_v48, %v445_v45  ;;  %v458_v58 = vadd.f32 1e-07, %v442_v46  ;;  %v452_v59 = vadd.f32 %v451_v51, %v450_v47 }
  0x59   : > { %275 = vrot.lane.b32.xlu1 %v2076_v37, %s1862_s19  ;;  %259 = vrot.lane.b32.xlu0 %v2079_v38, %s1862_s19  ;;  %1750 = vrcp.f32 %v457_v52 }
  0x5a   : > { %1667 = vmatpush3.msra.mxu1 %v606_v25  ;;  %1615 = vmatprep.subr.mxu0 %v605_v40  ;;  %v459_v62 = vadd.f32 1e-07, %v447_v54  ;;  %1752 = vrcp.f32 %v458_v58  ;;  %v460_v63 = vadd.f32 1e-07, %v452_v59 }
  0x5b   : > { %1660 = vmatprep.subr.mxu1 %v605_v40  ;;  %1616 = vmatpush3.msra.mxu0 %v605_v40 }
  0x5c   : > { %v1743_v32 = vpop.eup %1742  ;;  %1668 = vmatpush3.msra.mxu1 %v605_v40  ;;  %1754 = vrcp.f32 %v459_v62 }
  0x5d   : > { %261 = vrot.lane.b32.xlu1 %v2087_v43, %s1862_s19  ;;  %287 = vrot.lane.b32.xlu0 %v2071_v34, %s1862_s19  ;;  %v1745_v50 = vpop.eup %1744  ;;  %1756 = vrcp.f32 %v460_v63 }
  0x61   : > { %289 = vrot.lane.b32.xlu1 %v2090_v44, %s1862_s19  ;;  %277 = vrot.lane.b32.xlu0 %v2100_v49, %s1862_s19 }
  0x63   : > { %v1747_v2 = vpop.eup %1746 }
  0x64   : > { %v1749_v5 = vpop.eup %1748 }
  0x65   : > { %291 = vrot.lane.b32.xlu1 %v2109_v53, %s1862_s19  ;;  %477 = vrot.lane.b32.xlu0 %v1743_v32, %s1862_s19 }
  0x66   : > { %v1751_v6 = vpop.eup %1750 }
  0x67   : > { %v1753_v7 = vpop.eup %1752 }
  0x69   : > { %293 = vrot.lane.b32.xlu1 %v2113_v55, %s1862_s19  ;;  %479 = vrot.lane.b32.xlu0 %v1745_v50, %s1862_s19  ;;  %v1755_v9 = vpop.eup %1754 }
  0x6a   : > { %v1757_v10 = vpop.eup %1756 }
  0x6d   : > { %279 = vrot.lane.b32.xlu1 %v2116_v56, %s1862_s19  ;;  %263 = vrot.lane.b32.xlu0 %v2119_v57, %s1862_s19 }
  0x71   : > { %281 = vrot.lane.b32.xlu1 %v2123_v60, %s1862_s19  ;;  %265 = vrot.lane.b32.xlu0 %v2126_v61, %s1862_s19 }
  0x75   : > { %295 = vrot.lane.b32.xlu1 %v2149_v17, %s1862_s19  ;;  %481 = vrot.lane.b32.xlu0 %v1747_v2, %s1862_s19 }
  0x79   : > { %297 = vrot.lane.b32.xlu1 %v2152_v18, %s1862_s19  ;;  %483 = vrot.lane.b32.xlu0 %v1749_v5, %s1862_s19 }
  0x7d   : > { %487 = vrot.lane.b32.xlu1 %v1753_v7, %s1862_s19  ;;  %485 = vrot.lane.b32.xlu0 %v1751_v6, %s1862_s19 }
  0x81   : > { %491 = vrot.lane.b32.xlu1 %v1757_v10, %s1862_s19  ;;  %489 = vrot.lane.b32.xlu0 %v1755_v9, %s1862_s19 }
  0xb7   : > { %v254_v11 = vpop.permute.xlu1 %253  ;;  %v252_v12 = vpop.permute.xlu0 %251 }
  0xb8   : > { %v323_v31 = vmul.f32 %v252_v12, %v1998_v1  ;;  %v324_v40 = vmul.f32 %v254_v11, %v1995_v0 }
  0xba   : > { %v348_v41 = vsel %vm347_vm1, %v323_v31, 0.0  ;;  %v353_v52 = vsel %vm347_vm1, %v324_v40, 0.0 }
  0xbb   : > { %v2194_v14 = vpop.permute.xlu1 %269  ;;  %v2196_v15 = vpop.permute.xlu0 %267 }
  0xbc   : > { %v331_v30 = vmul.f32 %v2196_v15, %v2010_v4  ;;  %v332_v36 = vmul.f32 %v2194_v14, %v2007_v3 }
  0xbe   : > { %v349_v39 = vsel %vm347_vm1, %v331_v30, 0.0  ;;  %v354_v50 = vsel %vm347_vm1, %v332_v36, 0.0 }
  0xbf   : > { %v2198_v16 = vpop.permute.xlu1 %285  ;;  %v2200_v19 = vpop.permute.xlu0 %283  ;;  %v350_v48 = vadd.f32 %v349_v39, %v348_v41  ;;  %v355_v63 = vadd.f32 %v354_v50, %v353_v52 }
  0xc0   : > { %v339_v32 = vmul.f32 %v2200_v19, %v2019_v8  ;;  %v340_v42 = vmul.f32 %v2198_v16, %v2030_v13 }
  0xc2   : > { %v351_v47 = vsel %vm347_vm1, %v339_v32, 0.0  ;;  %v356_v59 = vsel %vm347_vm1, %v340_v42, 0.0 }
  0xc3   : > { %v2202_v20 = vpop.permute.xlu1 %271  ;;  %v2204_v23 = vpop.permute.xlu0 %255  ;;  %v2236_v51 = vadd.f32 %v351_v47, %v350_v48  ;;  %v2246_v5 = vadd.f32 %v356_v59, %v355_v63 }
  0xc4   : > { %v333_v9 = vmul.f32 %v2202_v20, %v2043_v21  ;;  %v325_v10 = vmul.f32 %v2204_v23, %v2046_v22 }
  0xc5   : > { %2932 = vst [vmem:[#allocation19_spill] sm:$0xff] %v2246_v5  ;;  %vm509_vm2 = vcmp.ge.f32.partialorder %v2236_v51, 0.0  ;;  %vm510_vm3 = vcmp.ge.f32.partialorder %v2246_v5, 0.0 }
  0xc6   : > { %v359_v42 = vsel %vm347_vm1, %v333_v9, 0.0 }
  0xc7   : > { %v2206_v24 = vpop.permute.xlu1 %273  ;;  %v2208_v25 = vpop.permute.xlu0 %257 }
  0xc8   : > { %v326_v47 = vmul.f32 %v2208_v25, %v2060_v28 }
  0xcb   : > { %v2210_v26 = vpop.permute.xlu1 %275  ;;  %v2212_v29 = vpop.permute.xlu0 %259 }
  0xcc   : > { %v335_v52 = vmul.f32 %v2210_v26, %v2076_v37  ;;  %v327_v9 = vmul.f32 %v2212_v29, %v2079_v38 }
  0xcf   : > { %v2219_v33 = vpop.permute.xlu1 %261  ;;  %v2221_v35 = vpop.permute.xlu0 %287 }
  0xd0   : > { %v341_v36 = vmul.f32 %v2221_v35, %v2071_v34 }
  0xd3   : > { %v2230_v45 = vpop.permute.xlu1 %289  ;;  %v2232_v46 = vpop.permute.xlu0 %277 }
  0xd7   : > { %v2239_v54 = vpop.permute.xlu1 %291  ;;  %v478_v58 = vpop.permute.xlu0 %477 }
  0xd8   : > { %2931 = vst [vmem:[#allocation18_spill] sm:$0xff] %v2239_v54  ;;  %v2243_v62 = vmul.f32 %v478_v58, %v2236_v51 }
  0xda   : > { %v517_v2 = vmul.f32 %v2243_v62, %v252_v12  ;;  %v334_v12 = vmul.f32 %v2206_v24, %v2057_v27 }
  0xdb   : > { %v2248_v6 = vpop.permute.xlu1 %293  ;;  %v480_v7 = vpop.permute.xlu0 %479 }
  0xdc   : > { %2933 = vst [vmem:[#allocation20_spill] sm:$0xff] %v2248_v6  ;;  %v2255_v30 = vmul.f32 %v480_v7, %v2246_v5  ;;  %v541_v31 = vsub.f32 %v1998_v1, %v517_v2  ;;  %v361_v2 = vsel %vm347_vm1, %v341_v36, 0.0  ;;  %v363_v7 = vsel %vm347_vm1, %v326_v47, 0.0 }
  0xde   : > { %v518_v32 = vmul.f32 %v2255_v30, %v254_v11  ;;  %v581_v40 = vsel %vm509_vm2, %v1998_v1, %v541_v31  ;;  %v358_v11 = vsel %vm347_vm1, %v325_v10, 0.0  ;;  %v364_v1 = vsel %vm347_vm1, %v334_v12, 0.0 }
  0xdf   : > { %v2264_v39 = vpop.permute.xlu1 %279  ;;  %v2269_v41 = vpop.permute.xlu0 %263  ;;  %1617 = vmatprep.mubr.msk.f32.mxu0 %vm347_vm1, %v581_v40  ;;  %v360_v63 = vadd.f32 %v359_v42, %v358_v11  ;;  %v336_v10 = vmul.f32 %v2232_v46, %v2100_v49  ;;  %v328_v31 = vmul.f32 %v2219_v33, %v2087_v43  ;;  %v344_v12 = vmul.f32 %v2248_v6, %v2113_v55 }
  0xe0   : > { %v542_v48 = vsub.f32 %v1995_v0, %v518_v32  ;;  %v343_v32 = vmul.f32 %v2239_v54, %v2109_v53  ;;  %v369_v40 = vsel %vm347_vm1, %v335_v52, 0.0  ;;  %v365_v47 = vadd.f32 %v364_v1, %v363_v7 }
  0xe1   : > { %v2303_v36 = vadd.f32 %v361_v2, %v360_v63  ;;  %v373_v5 = vsel %vm347_vm1, %v328_v31, 0.0  ;;  %v337_v63 = vmul.f32 %v2264_v39, %v2116_v56  ;;  %v376_v52 = vsel %vm347_vm1, %v344_v12, 0.0 }
  0xe2   : > { %v582_v50 = vsel %vm510_vm3, %v1995_v0, %v542_v48  ;;  %v342_v0 = vmul.f32 %v2230_v45, %v2090_v44  ;;  %v368_v48 = vsel %vm347_vm1, %v327_v9, 0.0  ;;  %v371_v2 = vsel %vm347_vm1, %v343_v32, 0.0 }
  0xe3   : > { %v2284_v58 = vpop.permute.xlu1 %281  ;;  %1618 = vmatmul.mubr.msk.f32.vlgmr.msra.gmra.mxu0 %vm347_vm1, %v582_v50  ;;  %v2287_v59 = vpop.permute.xlu0 %265  ;;  %v374_v50 = vsel %vm347_vm1, %v336_v10, 0.0  ;;  %v329_v1 = vmul.f32 %v2269_v41, %v2119_v57  ;;  %v370_v55 = vadd.f32 %v369_v40, %v368_v48  ;;  %vm511_vm4 = vcmp.ge.f32.partialorder %v2303_v36, 0.0 }
  0xe4   : > { %v366_v53 = vsel %vm347_vm1, %v342_v0, 0.0  ;;  %v338_v7 = vmul.f32 %v2284_v58, %v2123_v60  ;;  %v330_v9 = vmul.f32 %v2287_v59, %v2126_v61  ;;  %v375_v12 = vadd.f32 %v374_v50, %v373_v5 }
  0xe5   : > { %v2329_v31 = vadd.f32 %v366_v53, %v365_v47  ;;  %v379_v54 = vsel %vm347_vm1, %v337_v63, 0.0  ;;  %v2343_v47 = vadd.f32 %v371_v2, %v370_v55  ;;  %v378_v5 = vsel %vm347_vm1, %v329_v1, 0.0 }
  0xe6   : > { %v2341_v53 = vadd.f32 %v376_v52, %v375_v12  ;;  %v384_v40 = vsel %vm347_vm1, %v338_v7, 0.0  ;;  %v383_v48 = vsel %vm347_vm1, %v330_v9, 0.0  ;;  %v380_v9 = vadd.f32 %v379_v54, %v378_v5 }
  0xe7   : > { %v2306_v42 = vpop.permute.xlu1 %295  ;;  %v482_v11 = vpop.permute.xlu0 %481  ;;  %vm512_vm5 = vcmp.ge.f32.partialorder %v2329_v31, 0.0  ;;  %vm513_vm6 = vcmp.ge.f32.partialorder %v2343_v47, 0.0 }
  0xe8   : > { %v2311_v44 = vmul.f32 %v482_v11, %v2303_v36  ;;  %v345_v32 = vmul.f32 %v2306_v42, %v2149_v17  ;;  %vm514_vm7 = vcmp.ge.f32.partialorder %v2341_v53, 0.0 }
  0xea   : > { %v519_v0 = vmul.f32 %v2311_v44, %v2204_v23  ;;  %v381_v7 = vsel %vm347_vm1, %v345_v32, 0.0 }
  0xeb   : > { %v2327_v10 = vpop.permute.xlu1 %297  ;;  %v484_v11 = vpop.permute.xlu0 %483 }
  0xec   : > { %v543_v6 = vsub.f32 %v2046_v22, %v519_v0  ;;  %v346_v27 = vmul.f32 %v2327_v10, %v2152_v18  ;;  %v2339_v23 = vmul.f32 %v484_v11, %v2329_v31  ;;  %v533_v11 = vmul.f32 %v2243_v62, %v2200_v19 }
  0xed   : > { %v2381_v19 = vadd.f32 %v381_v7, %v380_v9 }
  0xee   : > { %v583_v50 = vsel %vm511_vm4, %v2046_v22, %v543_v6  ;;  %v520_v63 = vmul.f32 %v2339_v23, %v2208_v25  ;;  %v386_v1 = vsel %vm347_vm1, %v346_v27, 0.0  ;;  %v525_v22 = vmul.f32 %v2243_v62, %v2196_v15 }
  0xef   : > { %v488_v0 = vpop.permute.xlu1 %487  ;;  %1620 = vmatprep.mubr.msk.f32.mxu0 %vm347_vm1, %v583_v50  ;;  %v486_v55 = vpop.permute.xlu0 %485  ;;  %v385_v25 = vadd.f32 %v384_v40, %v383_v48  ;;  %v557_v48 = vsub.f32 %v2019_v8, %v533_v11  ;;  %vm515_vm9 = vcmp.ge.f32.partialorder %v2381_v19, 0.0 }
  0xf0   : > { %v2356_v52 = vmul.f32 %v488_v0, %v2341_v53  ;;  %v2359_v2 = vmul.f32 %v486_v55, %v2343_v47  ;;  %v544_v6 = vsub.f32 %v2060_v28, %v520_v63  ;;  %v549_v40 = vsub.f32 %v2010_v4, %v525_v22 }
  0xf1   : > { %v2376_v0 = vadd.f32 %v386_v1, %v385_v25  ;;  %v526_v25 = vmul.f32 %v2255_v30, %v2194_v14 }
  0xf2   : > { %v522_v12 = vmul.f32 %v2356_v52, %v2219_v33  ;;  %v530_v50 = vmul.f32 %v2356_v52, %v2232_v46  ;;  %v521_v27 = vmul.f32 %v2359_v2, %v2212_v29  ;;  %v529_v32 = vmul.f32 %v2359_v2, %v2210_v26 }
  0xf3   : > { %v492_v15 = vpop.permute.xlu1 %491  ;;  %v584_v54 = vsel %vm512_vm5, %v2060_v28, %v544_v6  ;;  %v490_v62 = vpop.permute.xlu0 %489  ;;  %vm516_vm8 = vcmp.ge.f32.partialorder %v2376_v0, 0.0 }
  0xf4   : > { %v546_v33 = vsub.f32 %v2087_v43, %v522_v12  ;;  %v554_v46 = vsub.f32 %v2100_v49, %v530_v50  ;;  %v545_v29 = vsub.f32 %v2079_v38, %v521_v27  ;;  %1621 = vmatmul.mubr.msk.f32.gmra.mxu0 %vm347_vm1, %v584_v54  ;;  %v508_v26 = vmul.f32 %v492_v15, %v2376_v0  ;;  %v2934_v12 = vld [vmem:[#allocation18_spill] sm:$0xff]  ;;  %v2938_v54 = vld [vmem:[#allocation20_spill] sm:$0xff] }
  0xf5   : > { %v507_v5 = vmul.f32 %v490_v62, %v2381_v19  ;;  %v553_v28 = vsub.f32 %v2076_v37, %v529_v32  ;;  %v2937_v32 = vld [vmem:[#allocation15_spill] sm:$0xff]  ;;  %v2939_v62 = vld [vmem:[#allocation16_spill] sm:$0xff] }
  0xf6   : > { %v585_v63 = vsel %vm513_vm6, %v2079_v38, %v545_v29  ;;  %v586_v55 = vsel %vm514_vm7, %v2087_v43, %v546_v33  ;;  %v524_v1 = vmul.f32 %v508_v26, %v2287_v59  ;;  %v532_v7 = vmul.f32 %v508_v26, %v2284_v58 }
  0xf7   : > { %v523_v6 = vmul.f32 %v507_v5, %v2269_v41  ;;  %1623 = vmatprep.mubr.msk.f32.mxu0 %vm347_vm1, %v585_v63  ;;  %v594_v22 = vsel %vm514_vm7, %v2100_v49, %v554_v46  ;;  %v534_v38 = vmul.f32 %v2255_v30, %v2198_v16  ;;  %v531_v43 = vmul.f32 %v507_v5, %v2264_v39 }
  0xf8   : > { %v593_v58 = vsel %vm513_vm6, %v2076_v37, %v553_v28  ;;  %1624 = vmatmul.mubr.msk.f32.gmra.mxu0 %vm347_vm1, %v586_v55  ;;  %v527_v41 = vmul.f32 %v2311_v44, %v2202_v20  ;;  %v548_v59 = vsub.f32 %v2126_v61, %v524_v1  ;;  %v556_v49 = vsub.f32 %v2123_v60, %v532_v7 }
  0xf9   : > { %v547_v14 = vsub.f32 %v2119_v57, %v523_v6  ;;  %1635 = vmatprep.mubr.msk.f32.mxu1 %vm347_vm1, %v593_v58  ;;  %v535_v16 = vmul.f32 %v2311_v44, %v2221_v35  ;;  %v555_v37 = vsub.f32 %v2116_v56, %v531_v43  ;;  %v550_v35 = vsub.f32 %v2007_v3, %v526_v25 }
  0xfa   : > { %1636 = vmatmul.mubr.msk.f32.vlgmr.msra.gmra.mxu1 %vm347_vm1, %v594_v22  ;;  %v588_v30 = vsel %vm516_vm8, %v2126_v61, %v548_v59  ;;  %v596_v44 = vsel %vm516_vm8, %v2123_v60, %v556_v49  ;;  %v528_v39 = vmul.f32 %v2339_v23, %v2206_v24  ;;  %v558_v61 = vsub.f32 %v2030_v13, %v534_v38 }
  0xfb   : > { %v587_v20 = vsel %vm515_vm9, %v2119_v57, %v547_v14  ;;  %v595_v9 = vsel %vm515_vm9, %v2116_v56, %v555_v37  ;;  %v589_v57 = vsel %vm509_vm2, %v2010_v4, %v549_v40  ;;  %v551_v11 = vsub.f32 %v2043_v21, %v527_v41 }
  0xfc   : > { %1626 = vmatprep.mubr.msk.f32.mxu0 %vm347_vm1, %v587_v20  ;;  %v536_v60 = vmul.f32 %v2339_v23, %v2230_v45  ;;  %1638 = vmatprep.mubr.msk.f32.mxu1 %vm347_vm1, %v595_v9  ;;  %v559_v24 = vsub.f32 %v2071_v34, %v535_v16  ;;  %v537_v56 = vmul.f32 %v2359_v2, %v2934_v12  ;;  %v2935_v45 = vld [vmem:[#allocation14_spill] sm:$0xff] }
  0xfd   : > { %1627 = vmatmul.mubr.msk.f32.gmra.mxu0 %vm347_vm1, %v588_v30  ;;  %v597_v4 = vsel %vm509_vm2, %v2019_v8, %v557_v48  ;;  %v552_v23 = vsub.f32 %v2935_v45, %v528_v39  ;;  %v590_v27 = vsel %vm510_vm3, %v2007_v3, %v550_v35  ;;  %v538_v2 = vmul.f32 %v2356_v52, %v2938_v54  ;;  %v2940_v52 = vld [vmem:[#allocation17_spill] sm:$0xff] }
  0xfe   : > { %1639 = vmatmul.mubr.msk.f32.gmra.mxu1 %vm347_vm1, %v596_v44  ;;  %1629 = vmatprep.mubr.msk.f32.mxu0 %vm347_vm1, %v589_v57  ;;  %v560_v15 = vsub.f32 %v2937_v32, %v536_v60  ;;  %v598_v51 = vsel %vm510_vm3, %v2030_v13, %v558_v61  ;;  %v591_v8 = vsel %vm511_vm4, %v2043_v21, %v551_v11 }
  0xff   : > { %1641 = vmatprep.mubr.msk.f32.mxu1 %vm347_vm1, %v597_v4  ;;  %v561_v33 = vsub.f32 %v2939_v62, %v537_v56  ;;  %v539_v46 = vmul.f32 %v507_v5, %v2306_v42  ;;  %v599_v3 = vsel %vm511_vm4, %v2071_v34, %v559_v24  ;;  %v592_v13 = vsel %vm512_vm5, %v2935_v45, %v552_v23 }
 0x100   : > { %v562_v21 = vsub.f32 %v2940_v52, %v538_v2  ;;  %v540_v29 = vmul.f32 %v508_v26, %v2327_v10  ;;  %v600_v42 = vsel %vm512_vm5, %v2937_v32, %v560_v15 }
 0x101   : > { %1630 = vmatmul.mubr.msk.f32.gmra.mxu0 %vm347_vm1, %v590_v27  ;;  %v563_v5 = vsub.f32 %v2149_v17, %v539_v46  ;;  %v601_v34 = vsel %vm513_vm6, %v2939_v62, %v561_v33  ;;  %v1086_v27 = vlaneseq }
 0x102   : > { %1642 = vmatmul.mubr.msk.f32.gmra.mxu1 %vm347_vm1, %v598_v51  ;;  %1632 = vmatprep.mubr.msk.f32.mxu0 %vm347_vm1, %v591_v8  ;;  %v564_v36 = vsub.f32 %v2152_v18, %v540_v29  ;;  %v602_v10 = vsel %vm514_vm7, %v2940_v52, %v562_v21 }
 0x103   : > { %1644 = vmatprep.mubr.msk.f32.mxu1 %vm347_vm1, %v599_v3  ;;  %v603_v31 = vsel %vm515_vm9, %v2149_v17, %v563_v5  ;;  %v1087_v5 = vshrl.u32 %v1086_v27, 7  ;;  %vm1403_vm9 = vcmask 1042434  }
 0x104   : > { %v604_v47 = vsel %vm516_vm8, %v2152_v18, %v564_v36  ;;  %vm1401_vm8 = vcmask 1041409  }
 0x105   : > { %1633 = vmatmul.mubr.msk.f32.gmra.mxu0 %vm347_vm1, %v592_v13 }
 0x106   : > { %1645 = vmatmul.mubr.msk.f32.gmra.mxu1 %vm347_vm1, %v600_v42 }
 0x107   : > { %1647 = vmatprep.mubr.msk.f32.mxu1 %vm347_vm1, %v601_v34 }
 0x10a   : > { %1648 = vmatmul.mubr.msk.f32.gmra.mxu1 %vm347_vm1, %v602_v10 }
 0x10b   : > { %1650 = vmatprep.mubr.msk.f32.mxu1 %vm347_vm1, %v603_v31 }
 0x10e   : > { %1651 = vmatmul.mubr.msk.f32.gmra.mxu1 %vm347_vm1, %v604_v47 }
 0x1a3   : > { %v2512_v26 = vpop.f32.mrf.mxu0 }
 0x1a4   : > { %896 = vrot.lane.b32.xlu1 %v2512_v26, %s1862_s19 }
 0x1a5   : > { %v2516_v53 = vpop.f32.mrf.mxu0 }
 0x1b4   : > { %v2518_v28 = vpop.f32.mrf.mxu0 }
 0x1b6   : > { %v2524_v17 = vpop.f32.mrf.mxu0 }
 0x1b8   : > { %v2534_v19 = vpop.f32.mrf.mxu0 }
 0x1ba   : > { %v2520_v40 = vpop.f32.mrf.mxu1  ;;  %v2542_v63 = vpop.f32.mrf.mxu0 }
 0x1bb   : > { %920 = vrot.lane.b32.xlu0 %v2520_v40, %s1862_s19 }
 0x1bc   : > { %v2526_v0 = vpop.f32.mrf.mxu1 }
 0x1bd   : > { %918 = vrot.lane.b32.xlu1 %v2526_v0, %s1862_s19  ;;  %v2550_v1 = vpop.f32.mrf.mxu0 }
 0x1be   : > { %v2530_v18 = vpop.f32.mrf.mxu1 }
 0x1bf   : > { %894 = vrot.lane.b32.xlu0 %v2516_v53, %s1862_s19  ;;  %v2558_v6 = vpop.f32.mrf.mxu0 }
 0x1c0   : > { %v2536_v48 = vpop.f32.mrf.mxu1 }
 0x1c1   : > { %922 = vrot.lane.b32.xlu1 %v2536_v48, %s1862_s19  ;;  %v2566_v25 = vpop.f32.mrf.mxu0 }
 0x1c2   : > { %v2544_v55 = vpop.f32.mrf.mxu1 }
 0x1c3   : > { %900 = vrot.lane.b32.xlu0 %v2518_v28, %s1862_s19  ;;  %v2572_v38 = vpop.f32.mrf.mxu0 }
 0x1c4   : > { %v2552_v7 = vpop.f32.mrf.mxu1 }
 0x1c5   : > { %928 = vrot.lane.b32.xlu1 %v2544_v55, %s1862_s19  ;;  %v2580_v58 = vpop.f32.mrf.mxu0 }
 0x1c6   : > { %v2560_v22 = vpop.f32.mrf.mxu1 }
 0x1c7   : > { %924 = vrot.lane.b32.xlu0 %v2530_v18, %s1862_s19  ;;  %v2588_v59 = vpop.f32.mrf.mxu0 }
 0x1c8   : > { %v2576_v43 = vpop.f32.mrf.mxu1 }
 0x1c9   : > { %904 = vrot.lane.b32.xlu1 %v2534_v19, %s1862_s19 }
 0x1ca   : > { %v2584_v41 = vpop.f32.mrf.mxu1 }
 0x1cb   : > { %898 = vrot.lane.b32.xlu0 %v2524_v17, %s1862_s19 }
 0x1cc   : > { %v2592_v49 = vpop.f32.mrf.mxu1 }
 0x1cd   : > { %932 = vrot.lane.b32.xlu1 %v2560_v22, %s1862_s19 }
 0x1ce   : > { %v2598_v14 = vpop.f32.mrf.mxu1 }
 0x1cf   : > { %926 = vrot.lane.b32.xlu0 %v2552_v7, %s1862_s19 }
 0x1d0   : > { %v2604_v16 = vpop.f32.mrf.mxu1 }
 0x1d1   : > { %908 = vrot.lane.b32.xlu1 %v2550_v1, %s1862_s19 }
 0x1d3   : > { %902 = vrot.lane.b32.xlu0 %v2542_v63, %s1862_s19 }
 0x1d5   : > { %912 = vrot.lane.b32.xlu1 %v2566_v25, %s1862_s19 }
 0x1d7   : > { %930 = vrot.lane.b32.xlu0 %v2576_v43, %s1862_s19 }
 0x1d9   : > { %916 = vrot.lane.b32.xlu1 %v2580_v58, %s1862_s19 }
 0x1db   : > { %906 = vrot.lane.b32.xlu0 %v2558_v6, %s1862_s19 }
 0x1dd   : > { %914 = vrot.lane.b32.xlu1 %v2588_v59, %s1862_s19 }
 0x1df   : > { %910 = vrot.lane.b32.xlu0 %v2572_v38, %s1862_s19 }
 0x1e1   : > { %936 = vrot.lane.b32.xlu1 %v2584_v41, %s1862_s19 }
 0x1e3   : > { %934 = vrot.lane.b32.xlu0 %v2592_v49, %s1862_s19 }
 0x1e5   : > { %940 = vrot.lane.b32.xlu1 %v2598_v14, %s1862_s19 }
 0x1e7   : > { %938 = vrot.lane.b32.xlu0 %v2604_v16, %s1862_s19 }
 0x216   : > { %v897_v37 = vpop.permute.xlu1 %896 }
 0x217   : > { %v967_v4 = vmul.f32 %v2512_v26, %v897_v37 }
 0x219   : > { %v995_v15 = vsel %vm347_vm1, %v967_v4, 0.0 }
 0x22d   : > { %v921_v20 = vpop.permute.xlu0 %920 }
 0x22e   : > { %v979_v54 = vmul.f32 %v2520_v40, %v921_v20 }
 0x22f   : > { %v919_v30 = vpop.permute.xlu1 %918 }
 0x230   : > { %v1016_v29 = vsel %vm347_vm1, %v979_v54, 0.0  ;;  %v978_v20 = vmul.f32 %v919_v30, %v2526_v0 }
 0x231   : > { %v895_v44 = vpop.permute.xlu0 %894 }
 0x232   : > { %v966_v36 = vmul.f32 %v895_v44, %v2516_v53 }
 0x233   : > { %v2608_v35 = vpop.permute.xlu1 %922 }
 0x235   : > { %v901_v39 = vpop.permute.xlu0 %900 }
 0x236   : > { %v969_v2 = vmul.f32 %v2518_v28, %v901_v39 }
 0x237   : > { %v929_v9 = vpop.permute.xlu1 %928 }
 0x238   : > { %v983_v23 = vmul.f32 %v2544_v55, %v929_v9  ;;  %v1005_v42 = vsel %vm347_vm1, %v969_v2, 0.0 }
 0x239   : > { %v2610_v57 = vpop.permute.xlu0 %924 }
 0x23a   : > { %v998_v33 = vsel %vm347_vm1, %v983_v23, 0.0 }
 0x23b   : > { %v905_v61 = vpop.permute.xlu1 %904 }
 0x23d   : > { %v899_v11 = vpop.permute.xlu0 %898 }
 0x23e   : > { %v968_v13 = vmul.f32 %v899_v11, %v2524_v17 }
 0x23f   : > { %v933_v60 = vpop.permute.xlu1 %932 }
 0x240   : > { %v985_v46 = vmul.f32 %v2560_v22, %v933_v60  ;;  %v971_v60 = vmul.f32 %v2534_v19, %v905_v61  ;;  %v1000_v4 = vsel %vm347_vm1, %v968_v13, 0.0 }
 0x241   : > { %v927_v24 = vpop.permute.xlu0 %926 }
 0x242   : > { %v1008_v39 = vsel %vm347_vm1, %v985_v46, 0.0  ;;  %v982_v44 = vmul.f32 %v927_v24, %v2552_v7 }
 0x243   : > { %v2612_v12 = vpop.permute.xlu1 %908 }
 0x244   : > { %v993_v46 = vsel %vm347_vm1, %v982_v44, 0.0 }
 0x245   : > { %v903_v56 = vpop.permute.xlu0 %902 }
 0x247   : > { %v913_v45 = vpop.permute.xlu1 %912 }
 0x248   : > { %v975_v50 = vmul.f32 %v2566_v25, %v913_v45 }
 0x249   : > { %v931_v32 = vpop.permute.xlu0 %930 }
 0x24a   : > { %v996_v51 = vsel %vm347_vm1, %v975_v50, 0.0  ;;  %v984_v31 = vmul.f32 %v931_v32, %v2576_v43  ;;  %v970_v50 = vmul.f32 %v903_v56, %v2542_v63 }
 0x24b   : > { %v997_v8 = vadd.f32 %v996_v51, %v995_v15  ;;  %v917_v62 = vpop.permute.xlu1 %916  ;;  %v990_v15 = vsel %vm347_vm1, %v966_v36, 0.0 }
 0x24c   : > { %v977_v3 = vmul.f32 %v2580_v58, %v917_v62  ;;  %v1003_v54 = vsel %vm347_vm1, %v984_v31, 0.0 }
 0x24d   : > { %v2625_v52 = vadd.f32 %v998_v33, %v997_v8  ;;  %v2627_v21 = vpop.permute.xlu0 %906  ;;  %v1015_v33 = vsel %vm347_vm1, %v971_v60, 0.0 }
 0x24e   : > { %v1006_v34 = vsel %vm347_vm1, %v977_v3, 0.0 }
 0x24f   : > { %v1037_v10 = vsel %vm347_vm1, %v2625_v52, -inf  ;;  %v1007_v47 = vadd.f32 %v1006_v34, %v1005_v42  ;;  %v915_v37 = vpop.permute.xlu1 %914  ;;  %v1010_v34 = vsel %vm347_vm1, %v970_v50, 0.0 }
 0x250   : > { %v1038_v9 = vrot.slane %v1037_v10, 4  ;;  %v976_v11 = vmul.f32 %v915_v37, %v2588_v59 }
 0x251   : > { %v2642_v45 = vadd.f32 %v1008_v39, %v1007_v47  ;;  %v911_v23 = vpop.permute.xlu0 %910  ;;  %v1011_v47 = vsel %vm347_vm1, %v978_v20, 0.0 }
 0x252   : > { %v1039_v27 = vmax.f32 %v1037_v10, %v1038_v9  ;;  %v1001_v32 = vsel %vm347_vm1, %v976_v11, 0.0  ;;  %v974_v30 = vmul.f32 %v911_v23, %v2572_v38  ;;  %v1017_v23 = vadd.f32 %v1016_v29, %v1015_v33 }
 0x253   : > { %v1051_v61 = vsel %vm347_vm1, %v2642_v45, -inf  ;;  %v1002_v2 = vadd.f32 %v1001_v32, %v1000_v4  ;;  %v937_v51 = vpop.permute.xlu1 %936  ;;  %v1012_v32 = vadd.f32 %v1011_v47, %v1010_v34  ;;  %v973_v29 = vmul.f32 %v2550_v1, %v2612_v12 }
 0x254   : > { %v1040_v24 = vrot.slane %v1039_v27, 2  ;;  %v1052_v8 = vrot.slane %v1051_v61, 4  ;;  %v991_v62 = vsel %vm347_vm1, %v974_v30, 0.0  ;;  %v987_v56 = vmul.f32 %v2584_v41, %v937_v51 }
 0x255   : > { %v1004_v3 = vadd.f32 %v1003_v54, %v1002_v2  ;;  %v992_v13 = vadd.f32 %v991_v62, %v990_v15  ;;  %v935_v42 = vpop.permute.xlu0 %934  ;;  %v2661_v30 = vcvt.s32.f32 %v1087_v5  ;;  %v1025_v47 = vsel %vm347_vm1, %v973_v29, 0.0 }
 0x256   : > { %v1041_v36 = vmax.f32 %v1039_v27, %v1040_v24  ;;  %v1053_v10 = vmax.f32 %v1051_v61, %v1052_v8  ;;  %v986_v31 = vmul.f32 %v935_v42, %v2592_v49  ;;  %v1018_v9 = vsel %vm347_vm1, %v987_v56, 0.0 }
 0x257   : > { %v1044_v37 = vsel %vm347_vm1, %v1004_v3, -inf  ;;  %v994_v39 = vadd.f32 %v993_v46, %v992_v13  ;;  %v2664_v61 = vadd.f32 %v1018_v9, %v1017_v23  ;;  %v941_v62 = vpop.permute.xlu1 %940  ;;  %v981_v42 = vmul.f32 %v2530_v18, %v2610_v57 }
 0x258   : > { %v1042_v11 = vrot.slane %v1041_v36, 1  ;;  %v1054_v60 = vrot.slane %v1053_v10, 2  ;;  %v1045_v4 = vrot.slane %v1044_v37, 4  ;;  %v1013_v44 = vsel %vm347_vm1, %v986_v31, 0.0 }
 0x259   : > { %v1030_v50 = vsel %vm347_vm1, %v994_v39, -inf  ;;  %v2666_v2 = vadd.f32 %v1013_v44, %v1012_v32  ;;  %v1026_v44 = vsel %vm347_vm1, %v981_v42, 0.0 }
 0x25a   : > { %v1043_v27 = vmax.f32 %v1041_v36, %v1042_v11  ;;  %v1055_v15 = vmax.f32 %v1053_v10, %v1054_v60  ;;  %v1046_v54 = vmax.f32 %v1044_v37, %v1045_v4  ;;  %v1031_v20 = vrot.slane %v1030_v50, 4 }
 0x25b   : > { %v989_v36 = vmul.f32 %v2598_v14, %v941_v62  ;;  %v1058_v31 = vsel %vm347_vm1, %v2666_v2, -inf  ;;  %v1027_v32 = vadd.f32 %v1026_v44, %v1025_v47 }
 0x25c   : > { %vm1090_vm10 = vcmp.eq.f32.partialorder %v2625_v52, %v1043_v27  ;;  %v1056_v51 = vrot.slane %v1055_v15, 1  ;;  %v1047_v24 = vrot.slane %v1046_v54, 2  ;;  %v1032_v8 = vmax.f32 %v1030_v50, %v1031_v20 }
 0x25d   : > { %v1098_v5 = vsel %vm1090_vm10, %v2661_v30, 8.0  ;;  %v1065_v52 = vsel %vm347_vm1, %v2664_v61, -inf  ;;  %v1059_v23 = vrot.slane %v1058_v31, 4 }
 0x25e   : > { %v1112_v56 = vsel %vm347_vm1, %v1098_v5, inf  ;;  %v1057_v33 = vmax.f32 %v1055_v15, %v1056_v51  ;;  %v1048_v46 = vmax.f32 %v1046_v54, %v1047_v24  ;;  %v1033_v13 = vrot.slane %v1032_v8, 2 }
 0x25f   : > { %v1113_v34 = vrot.slane %v1112_v56, 4  ;;  %v1066_v4 = vrot.slane %v1065_v52, 4  ;;  %v1060_v24 = vmax.f32 %v1058_v31, %v1059_v23 }
 0x260   : > { %vm1092_vm11 = vcmp.eq.f32.partialorder %v2642_v45, %v1057_v33  ;;  %v1049_v10 = vrot.slane %v1048_v46, 1  ;;  %v1034_v12 = vmax.f32 %v1032_v8, %v1033_v13  ;;  %v1028_v45 = vsel %vm347_vm1, %v989_v36, 0.0 }
 0x261   : > { %v1114_v37 = vmin.f32 %v1112_v56, %v1113_v34  ;;  %v1100_v9 = vsel %vm1092_vm11, %v2661_v30, 8.0  ;;  %v1067_v20 = vmax.f32 %v1065_v52, %v1066_v4  ;;  %v2687_v51 = vadd.f32 %v1028_v45, %v1027_v32 }
 0x262   : > { %v1126_v57 = vsel %vm347_vm1, %v1100_v9, inf  ;;  %v1050_v11 = vmax.f32 %v1048_v46, %v1049_v10  ;;  %v1035_v60 = vrot.slane %v1034_v12, 1  ;;  %v1061_v46 = vrot.slane %v1060_v24, 2 }
 0x263   : > { %v1127_v50 = vrot.slane %v1126_v57, 4  ;;  %v1115_v15 = vrot.slane %v1114_v37, 2  ;;  %v1068_v56 = vrot.slane %v1067_v20, 2  ;;  %v1079_v33 = vsel %vm347_vm1, %v2687_v51, -inf }
 0x264   : > { %vm1091_vm12 = vcmp.eq.f32.partialorder %v1004_v3, %v1050_v11  ;;  %v1036_v27 = vmax.f32 %v1034_v12, %v1035_v60  ;;  %v1080_v34 = vrot.slane %v1079_v33, 4  ;;  %v1062_v10 = vmax.f32 %v1060_v24, %v1061_v46 }
 0x265   : > { %v1099_v54 = vsel %vm1091_vm12, %v2661_v30, 8.0  ;;  %v1128_v8 = vmin.f32 %v1126_v57, %v1127_v50  ;;  %v1116_v29 = vmin.f32 %v1114_v37, %v1115_v15  ;;  %v1069_v36 = vmax.f32 %v1067_v20, %v1068_v56 }
 0x266   : > { %vm1089_vm13 = vcmp.eq.f32.partialorder %v994_v39, %v1036_v27  ;;  %v1119_v5 = vsel %vm347_vm1, %v1099_v54, inf  ;;  %v1081_v37 = vmax.f32 %v1079_v33, %v1080_v34  ;;  %v1063_v11 = vrot.slane %v1062_v10, 1 }
 0x267   : > { %v1097_v62 = vsel %vm1089_vm13, %v2661_v30, 8.0  ;;  %v1129_v13 = vrot.slane %v1128_v8, 2  ;;  %v1120_v42 = vrot.slane %v1119_v5, 4  ;;  %v1117_v39 = vrot.slane %v1116_v29, 1 }
 0x268   : > { %v1105_v3 = vsel %vm347_vm1, %v1097_v62, inf  ;;  %v1070_v57 = vrot.slane %v1069_v36, 1  ;;  %v1082_v44 = vrot.slane %v1081_v37, 2  ;;  %v1064_v32 = vmax.f32 %v1062_v10, %v1063_v11  ;;  %v939_v62 = vpop.permute.xlu0 %938 }
 0x269   : > { %v1106_v52 = vrot.slane %v1105_v3, 4  ;;  %v1130_v12 = vmin.f32 %v1128_v8, %v1129_v13  ;;  %v1121_v31 = vmin.f32 %v1119_v5, %v1120_v42  ;;  %v1118_v47 = vmin.f32 %v1116_v29, %v1117_v39 }
 0x26a   : > { %v1071_v45 = vmax.f32 %v1069_v36, %v1070_v57  ;;  %v972_v20 = vmul.f32 %v2627_v21, %v2558_v6  ;;  %v1083_v24 = vmax.f32 %v1081_v37, %v1082_v44  ;;  %vm1093_vm0 = vcmp.eq.f32.partialorder %v2666_v2, %v1064_v32 }
 0x26b   : > { %v1107_v9 = vmin.f32 %v1105_v3, %v1106_v52  ;;  %v1131_v60 = vrot.slane %v1130_v12, 1  ;;  %v1122_v4 = vrot.slane %v1121_v31, 2  ;;  %vm1162_vm14 = vcmp.eq.f32.partialorder %v2661_v30, %v1118_v47 }
 0x26c   : > { %v1186_v50 = vsel %vm1162_vm14, %v2512_v26, 0.0  ;;  %v1194_v54 = vsel %vm1162_vm14, %v2566_v25, 0.0  ;;  %vm1094_vm15 = vcmp.eq.f32.partialorder %v2664_v61, %v1071_v45  ;;  %v1202_v29 = vsel %vm1162_vm14, %v2544_v55, 0.0 }
 0x26d   : > { %v1108_v23 = vrot.slane %v1107_v9, 2  ;;  %v1132_v27 = vmin.f32 %v1130_v12, %v1131_v60  ;;  %v1123_v15 = vmin.f32 %v1121_v31, %v1122_v4  ;;  %v1216_v5 = vsel %vm347_vm1, %v1186_v50, 0.0 }
 0x26e   : > { %v980_v26 = vmul.f32 %v2608_v35, %v2536_v48  ;;  %v1272_v56 = vsel %vm347_vm1, %v1194_v54, 0.0  ;;  %v1020_v21 = vsel %vm347_vm1, %v972_v20, 0.0  ;;  %v1102_v33 = vsel %vm1094_vm15, %v2661_v30, 8.0 }
 0x26f   : > { %v1109_v8 = vmin.f32 %v1107_v9, %v1108_v23  ;;  %vm1164_vm2 = vcmp.eq.f32.partialorder %v2661_v30, %v1132_v27  ;;  %v1124_v25 = vrot.slane %v1123_v15, 1  ;;  %v1084_v61 = vrot.slane %v1083_v24, 1 }
 0x270   : > { %v988_v3 = vmul.f32 %v939_v62, %v2604_v16  ;;  %v1217_v55 = vrot.slane %v1216_v5, 4  ;;  %v1328_v46 = vsel %vm347_vm1, %v1202_v29, 0.0  ;;  %v1101_v2 = vsel %vm1093_vm0, %v2661_v30, 8.0 }
 0x271   : > { %v1110_v13 = vrot.slane %v1109_v8, 1  ;;  %v1273_v42 = vrot.slane %v1272_v56, 4  ;;  %v1188_v35 = vsel %vm1164_vm2, %v2518_v28, 0.0  ;;  %v1021_v39 = vsel %vm347_vm1, %v980_v26, 0.0 }
 0x272   : > { %v1125_v34 = vmin.f32 %v1123_v15, %v1124_v25  ;;  %v1140_v52 = vsel %vm347_vm1, %v1102_v33, inf  ;;  %v1329_v36 = vrot.slane %v1328_v46, 4  ;;  %v1022_v10 = vadd.f32 %v1021_v39, %v1020_v21 }
 0x273   : > { %v1133_v12 = vsel %vm347_vm1, %v1101_v2, inf  ;;  %v1023_v31 = vsel %vm347_vm1, %v988_v3, 0.0  ;;  %v1218_v47 = vadd.f32 %v1217_v55, %v1216_v5  ;;  %v1230_v37 = vsel %vm347_vm1, %v1188_v35, 0.0 }
 0x274   : > { %v1111_v9 = vmin.f32 %v1109_v8, %v1110_v13  ;;  %v1085_v57 = vmax.f32 %v1083_v24, %v1084_v61  ;;  %v1274_v11 = vadd.f32 %v1273_v42, %v1272_v56  ;;  %v1141_v60 = vrot.slane %v1140_v52, 4 }
 0x275   : > { %vm1163_vm3 = vcmp.eq.f32.partialorder %v2661_v30, %v1125_v34  ;;  %v1134_v28 = vrot.slane %v1133_v12, 4  ;;  %v2721_v4 = vadd.f32 %v1023_v31, %v1022_v10  ;;  %v1330_v44 = vadd.f32 %v1329_v36, %v1328_v46 }
 0x276   : > { %v1196_v23 = vsel %vm1164_vm2, %v2580_v58, 0.0  ;;  %v1204_v45 = vsel %vm1164_vm2, %v2560_v22, 0.0  ;;  %v1231_v32 = vrot.slane %v1230_v37, 4  ;;  %v1219_v50 = vrot.slane %v1218_v47, 2 }
 0x277   : > { %vm1161_vm4 = vcmp.eq.f32.partialorder %v2661_v30, %v1111_v9  ;;  %v1135_v15 = vmin.f32 %v1133_v12, %v1134_v28  ;;  %vm1096_vm5 = vcmp.eq.f32.partialorder %v2687_v51, %v1085_v57  ;;  %v1275_v54 = vrot.slane %v1274_v11, 2 }
 0x278   : > { %v1187_v20 = vsel %vm1163_vm3, %v2524_v17, 0.0  ;;  %v1142_v24 = vmin.f32 %v1140_v52, %v1141_v60  ;;  %v1104_v8 = vsel %vm1096_vm5, %v2661_v30, 8.0  ;;  %v1286_v58 = vsel %vm347_vm1, %v1196_v23, 0.0 }
 0x279   : > { %v1342_v27 = vsel %vm347_vm1, %v1204_v45, 0.0  ;;  %v1195_v22 = vsel %vm1163_vm3, %v2588_v59, 0.0  ;;  %v1154_v62 = vsel %vm347_vm1, %v1104_v8, inf  ;;  %v1232_v29 = vadd.f32 %v1231_v32, %v1230_v37 }
 0x27a   : > { %v1203_v51 = vsel %vm1163_vm3, %v2576_v43, 0.0  ;;  %v1185_v17 = vsel %vm1161_vm4, %v2516_v53, 0.0  ;;  %v1136_v5 = vrot.slane %v1135_v15, 2  ;;  %v1331_v26 = vrot.slane %v1330_v44, 2 }
 0x27b   : > { %v1223_v56 = vsel %vm347_vm1, %v1187_v20, 0.0  ;;  %v1193_v25 = vsel %vm1161_vm4, %v2572_v38, 0.0  ;;  %v1155_v59 = vrot.slane %v1154_v62, 4  ;;  %v1287_v21 = vrot.slane %v1286_v58, 4 }
 0x27c   : > { %v1279_v33 = vsel %vm347_vm1, %v1195_v22, 0.0  ;;  %v1143_v61 = vrot.slane %v1142_v24, 2  ;;  %v1072_v43 = vsel %vm347_vm1, %v2721_v4, -inf  ;;  %v1343_v3 = vrot.slane %v1342_v27, 4 }
 0x27d   : > { %v1335_v55 = vsel %vm347_vm1, %v1203_v51, 0.0  ;;  %v1201_v53 = vsel %vm1161_vm4, %v2552_v7, 0.0  ;;  %v1209_v46 = vsel %vm347_vm1, %v1185_v17, 0.0  ;;  %v1233_v13 = vrot.slane %v1232_v29, 2 }
 0x27e   : > { %v1224_v2 = vrot.slane %v1223_v56, 4  ;;  %v1265_v38 = vsel %vm347_vm1, %v1193_v25, 0.0  ;;  %v1137_v42 = vmin.f32 %v1135_v15, %v1136_v5  ;;  %v1220_v35 = vadd.f32 %v1219_v50, %v1218_v47 }
 0x27f   : > { %v1280_v39 = vrot.slane %v1279_v33, 4  ;;  %v1156_v34 = vmin.f32 %v1154_v62, %v1155_v59  ;;  %v1073_v52 = vrot.slane %v1072_v43, 4  ;;  %v1336_v36 = vrot.slane %v1335_v55, 4 }
 0x280   : > { %v1210_v10 = vrot.slane %v1209_v46, 4  ;;  %v1321_v12 = vsel %vm347_vm1, %v1201_v53, 0.0  ;;  %v1144_v31 = vmin.f32 %v1142_v24, %v1143_v61  ;;  %v1276_v37 = vadd.f32 %v1275_v54, %v1274_v11 }
 0x281   : > { %v1332_v57 = vadd.f32 %v1331_v26, %v1330_v44  ;;  %v1288_v9 = vadd.f32 %v1287_v21, %v1286_v58  ;;  %v1266_v7 = vrot.slane %v1265_v38, 4  ;;  %v1234_v60 = vadd.f32 %v1233_v13, %v1232_v29 }
 0x282   : > { %v1344_v28 = vadd.f32 %v1343_v3, %v1342_v27  ;;  %v1225_v23 = vadd.f32 %v1224_v2, %v1223_v56  ;;  %v1138_v45 = vrot.slane %v1137_v42, 1  ;;  %v1281_v32 = vadd.f32 %v1280_v39, %v1279_v33 }
 0x283   : > { %v1322_v20 = vrot.slane %v1321_v12, 4  ;;  %v1157_v15 = vrot.slane %v1156_v34, 2  ;;  %v1074_v47 = vmax.f32 %v1072_v43, %v1073_v52  ;;  %v1221_v50 = vrot.slane %v1220_v35, 1 }
 0x284   : > { %v1337_v8 = vadd.f32 %v1336_v36, %v1335_v55  ;;  %v1211_v22 = vadd.f32 %v1210_v10, %v1209_v46  ;;  %v1145_v62 = vrot.slane %v1144_v31, 1  ;;  %v1277_v51 = vrot.slane %v1276_v37, 1 }
 0x285   : > { %v1289_v17 = vrot.slane %v1288_v9, 2  ;;  %v1267_v5 = vadd.f32 %v1266_v7, %v1265_v38  ;;  %v1139_v24 = vmin.f32 %v1137_v42, %v1138_v45  ;;  %v1345_v11 = vrot.slane %v1344_v28, 2 }
 0x286   : > { %v1226_v44 = vrot.slane %v1225_v23, 2  ;;  %v1158_v54 = vmin.f32 %v1156_v34, %v1157_v15  ;;  %v1075_v58 = vrot.slane %v1074_v47, 2  ;;  %v1333_v29 = vrot.slane %v1332_v57, 1 }
 0x287   : > { %v1235_v27 = vrot.slane %v1234_v60, 1  ;;  %v1282_v26 = vrot.slane %v1281_v32, 2  ;;  %v1323_v56 = vadd.f32 %v1322_v20, %v1321_v12  ;;  %v2761_v25 = vadd.f32 %v1221_v50, %v1220_v35 }
 0x288   : > { %v1338_v59 = vrot.slane %v1337_v8, 2  ;;  %v1212_v21 = vrot.slane %v1211_v22, 2  ;;  %v1146_v33 = vmin.f32 %v1144_v31, %v1145_v62  ;;  %v2763_v61 = vadd.f32 %v1277_v51, %v1276_v37 }
 0x289   : > { %v2765_v43 = vadd.f32 %v1289_v17, %v1288_v9  ;;  %v1268_v3 = vrot.slane %v1267_v5, 2  ;;  %vm1165_vm6 = vcmp.eq.f32.partialorder %v2661_v30, %v1139_v24  ;;  %v2768_v55 = vadd.f32 %v1345_v11, %v1344_v28 }
 0x28a   : > { %v1227_v53 = vadd.f32 %v1226_v44, %v1225_v23  ;;  %v1159_v46 = vrot.slane %v1158_v54, 1  ;;  %v1076_v13 = vmax.f32 %v1074_v47, %v1075_v58  ;;  %v2770_v2 = vadd.f32 %v1333_v29, %v1332_v57 }
 0x28b   : > { %v2772_v38 = vadd.f32 %v1235_v27, %v1234_v60  ;;  %v1283_v42 = vadd.f32 %v1282_v26, %v1281_v32  ;;  %v1324_v35 = vrot.slane %v1323_v56, 2  ;;  %v2774_v39 = vadd.f32 %v1338_v59, %v1337_v8 }
 0x28c   : > { %v1213_v34 = vadd.f32 %v1212_v21, %v1211_v22  ;;  %vm1166_vm7 = vcmp.eq.f32.partialorder %v2661_v30, %v1146_v33  ;;  %v1189_v52 = vsel %vm1165_vm6, %v2542_v63, 0.0  ;;  %v1269_v36 = vadd.f32 %v1268_v3, %v1267_v5 }
 0x28d   : > { %v1197_v10 = vsel %vm1165_vm6, %v2526_v0, 0.0  ;;  %v1205_v12 = vsel %vm1165_vm6, %v2592_v49, 0.0  ;;  %v1077_v31 = vrot.slane %v1076_v13, 1  ;;  %v1291_v37 = vrot.slane %v2765_v43, 1 }
 0x28e   : > { %v1347_v57 = vrot.slane %v2768_v55, 1  ;;  %v1228_v9 = vrot.slane %v1227_v53, 1  ;;  %v1160_v7 = vmin.f32 %v1158_v54, %v1159_v46  ;;  %v1325_v60 = vadd.f32 %v1324_v35, %v1323_v56 }
 0x28f   : > { %v1190_v63 = vsel %vm1166_vm7, %v2534_v19, 0.0  ;;  %v1198_v0 = vsel %vm1166_vm7, %v2520_v40, 0.0  ;;  %v1237_v28 = vsel %vm347_vm1, %v1189_v52, 0.0  ;;  %v1214_v23 = vrot.slane %v1213_v34, 1 }
 0x290   : > { %v1206_v49 = vsel %vm1166_vm7, %v2584_v41, 0.0  ;;  %v1293_v45 = vsel %vm347_vm1, %v1197_v10, 0.0  ;;  %v1349_v32 = vsel %vm347_vm1, %v1205_v12, 0.0  ;;  %v1284_v20 = vrot.slane %v1283_v42, 1 }
 0x291   : > { %v1340_v15 = vrot.slane %v2774_v39, 1  ;;  %v1270_v19 = vrot.slane %v1269_v36, 1  ;;  %v1078_v47 = vmax.f32 %v1076_v13, %v1077_v31  ;;  %v1244_v50 = vsel %vm347_vm1, %v1190_v63, 0.0 }
 0x292   : > { %v1300_v40 = vsel %vm347_vm1, %v1198_v0, 0.0  ;;  %v1238_v8 = vrot.slane %v1237_v28, 4  ;;  %vm1168_vm10 = vcmp.eq.f32.partialorder %v2661_v30, %v1160_v7  ;;  %v1356_v22 = vsel %vm347_vm1, %v1206_v49, 0.0 }
 0x293   : > { %v1294_v41 = vrot.slane %v1293_v45, 4  ;;  %v1350_v62 = vrot.slane %v1349_v32, 4  ;;  %vm1095_vm11 = vcmp.eq.f32.partialorder %v2721_v4, %v1078_v47  ;;  %v1229_v51 = vadd.f32 %v1228_v9, %v1227_v53 }
 0x294   : > { %v1215_v17 = vadd.f32 %v1214_v23, %v1213_v34  ;;  %v1326_v5 = vrot.slane %v1325_v60, 1  ;;  %v1103_v24 = vsel %vm1095_vm11, %v2661_v30, 8.0  ;;  %v1271_v11 = vadd.f32 %v1270_v19, %v1269_v36 }
 0x295   : > { %v1245_v44 = vrot.slane %v1244_v50, 4  ;;  %v1192_v54 = vsel %vm1168_vm10, %v2550_v1, 0.0  ;;  %v1147_v58 = vsel %vm347_vm1, %v1103_v24, inf  ;;  %v1301_v29 = vrot.slane %v1300_v40, 4 }
 0x296   : > { %v1357_v27 = vrot.slane %v1356_v22, 4  ;;  %vm1405_vm12 = vcmask 1043459   ;;  %v1239_v26 = vadd.f32 %v1238_v8, %v1237_v28  ;;  %v1200_v4 = vsel %vm1168_vm10, %v2530_v18, 0.0 }
 0x297   : > { %v1295_v56 = vadd.f32 %v1294_v41, %v1293_v45  ;;  %v1351_v59 = vadd.f32 %v1350_v62, %v1349_v32  ;;  %v1208_v21 = vsel %vm1168_vm10, %v2598_v14, 0.0  ;;  %v1148_v33 = vrot.slane %v1147_v58, 4 }
 0x298   : > { %v1285_v3 = vadd.f32 %v1284_v20, %v1283_v42  ;;  %v1327_v53 = vadd.f32 %v1326_v5, %v1325_v60  ;;  %v1402_v1 = vsel %vm1401_vm8, %v2761_v25, %v1215_v17  ;;  %v1258_v46 = vsel %vm347_vm1, %v1192_v54, 0.0 }
 0x299   : > { %v1415_v13 = vsel %vm1401_vm8, %v2763_v61, %v1271_v11  ;;  %v1246_v35 = vadd.f32 %v1245_v44, %v1244_v50  ;;  %v1314_v18 = vsel %vm347_vm1, %v1200_v4, 0.0  ;;  %v1149_v34 = vmin.f32 %v1147_v58, %v1148_v33 }
 0x29a   : > { %v1302_v52 = vadd.f32 %v1301_v29, %v1300_v40  ;;  %v1358_v36 = vadd.f32 %v1357_v27, %v1356_v22  ;;  %v1240_v10 = vrot.slane %v1239_v26, 2  ;;  %v1370_v14 = vsel %vm347_vm1, %v1208_v21, 0.0 }
 0x29b   : > { %v1296_v12 = vrot.slane %v1295_v56, 2  ;;  %v1352_v42 = vrot.slane %v1351_v59, 2  ;;  %v1259_v31 = vrot.slane %v1258_v46, 4  ;;  %v1150_v9 = vrot.slane %v1149_v34, 2 }
 0x29c   : > { %v1292_v25 = vadd.f32 %v1291_v37, %v2765_v43  ;;  %v1341_v7 = vadd.f32 %v1340_v15, %v2774_v39  ;;  %v1404_v60 = vsel %vm1403_vm9, %v1229_v51, %v1402_v1  ;;  %v1315_v61 = vrot.slane %v1314_v18, 4 }
 0x29d   : > { %v1416_v63 = vsel %vm1403_vm9, %v1285_v3, %v1415_v13  ;;  %v1422_v0 = vsel %vm1401_vm8, %v2770_v2, %v1327_v53  ;;  %v1371_v28 = vrot.slane %v1370_v14, 4  ;;  %v1151_v23 = vmin.f32 %v1149_v34, %v1150_v9 }
 0x29e   : > { %v1247_v49 = vrot.slane %v1246_v35, 2  ;;  %v1303_v45 = vrot.slane %v1302_v52, 2  ;;  %v1359_v32 = vrot.slane %v1358_v36, 2  ;;  %v1241_v20 = vadd.f32 %v1240_v10, %v1239_v26 }
 0x29f   : > { %v1297_v19 = vadd.f32 %v1296_v12, %v1295_v56  ;;  %v1353_v47 = vadd.f32 %v1352_v42, %v1351_v59  ;;  %v1260_v50 = vadd.f32 %v1259_v31, %v1258_v46  ;;  %v1152_v43 = vrot.slane %v1151_v23, 1 }
 0x2a0   : > { %v1348_v39 = vadd.f32 %v1347_v57, %v2768_v55  ;;  %v1423_v37 = vsel %vm1403_vm9, %v1341_v7, %v1422_v0  ;;  %vm1407_vm13 = vcmask 1044484   ;;  %v1316_v15 = vadd.f32 %v1315_v61, %v1314_v18 }
 0x2a1   : > { %v1406_v2 = vsel %vm1405_vm12, %v2772_v38, %v1404_v60  ;;  %v1417_v40 = vsel %vm1405_vm12, %v1292_v25, %v1416_v63  ;;  %v1372_v8 = vadd.f32 %v1371_v28, %v1370_v14  ;;  %v1153_v22 = vmin.f32 %v1151_v23, %v1152_v43 }
 0x2a2   : > { %v1248_v41 = vadd.f32 %v1247_v49, %v1246_v35  ;;  %v1304_v62 = vadd.f32 %v1303_v45, %v1302_v52  ;;  %v1360_v51 = vadd.f32 %v1359_v32, %v1358_v36  ;;  %v1242_v17 = vrot.slane %v1241_v20, 1 }
 0x2a3   : > { %v1298_v5 = vrot.slane %v1297_v19, 1  ;;  %v1354_v24 = vrot.slane %v1353_v47, 1  ;;  %v1261_v11 = vrot.slane %v1260_v50, 2  ;;  %vm1167_vm14 = vcmp.eq.f32.partialorder %v2661_v30, %v1153_v22 }
 0x2a4   : > { %v1317_v55 = vrot.slane %v1316_v15, 2  ;;  %v1191_v57 = vsel %vm1167_vm14, %v2558_v6, 0.0  ;;  %v1199_v44 = vsel %vm1167_vm14, %v2536_v48, 0.0  ;;  %v1207_v38 = vsel %vm1167_vm14, %v2604_v16, 0.0 }
 0x2a5   : > { %v1373_v54 = vrot.slane %v1372_v8, 2  ;;  %v1251_v58 = vsel %vm347_vm1, %v1191_v57, 0.0  ;;  %v1307_v29 = vsel %vm347_vm1, %v1199_v44, 0.0  ;;  %v1363_v27 = vsel %vm347_vm1, %v1207_v38, 0.0 }
 0x2a6   : > { %v1424_v26 = vsel %vm1405_vm12, %v1348_v39, %v1423_v37  ;;  %v1252_v4 = vrot.slane %v1251_v58, 4  ;;  %v1308_v56 = vrot.slane %v1307_v29, 4  ;;  %v1364_v30 = vrot.slane %v1363_v27, 4 }
 0x2a7   : > { %v1249_v59 = vrot.slane %v1248_v41, 1  ;;  %v1305_v21 = vrot.slane %v1304_v62, 1  ;;  %v1243_v33 = vadd.f32 %v1242_v17, %v1241_v20  ;;  %v1299_v6 = vadd.f32 %v1298_v5, %v1297_v19 }
 0x2a8   : > { %v1355_v48 = vadd.f32 %v1354_v24, %v1353_v47  ;;  %v1253_v3 = vadd.f32 %v1252_v4, %v1251_v58  ;;  %v1309_v16 = vadd.f32 %v1308_v56, %v1307_v29  ;;  %v1365_v53 = vadd.f32 %v1364_v30, %v1363_v27 }
 0x2a9   : > { %v1361_v1 = vrot.slane %v1360_v51, 1  ;;  %v1262_v46 = vadd.f32 %v1261_v11, %v1260_v50  ;;  %v1318_v13 = vadd.f32 %v1317_v55, %v1316_v15  ;;  %v1374_v35 = vadd.f32 %v1373_v54, %v1372_v8 }
 0x2aa   : > { %vm1409_vm15 = vcmask 1045509   ;;  %v1254_v18 = vrot.slane %v1253_v3, 2  ;;  %v1310_v34 = vrot.slane %v1309_v16, 2  ;;  %v1366_v52 = vrot.slane %v1365_v53, 2 }
 0x2ab   : > { %v1250_v36 = vadd.f32 %v1249_v59, %v1248_v41  ;;  %v1306_v10 = vadd.f32 %v1305_v21, %v1304_v62  ;;  %v1408_v14 = vsel %vm1407_vm13, %v1243_v33, %v1406_v2  ;;  %v1418_v12 = vsel %vm1407_vm13, %v1299_v6, %v1417_v40 }
 0x2ac   : > { %v1425_v42 = vsel %vm1407_vm13, %v1355_v48, %v1424_v26  ;;  %v1255_v31 = vadd.f32 %v1254_v18, %v1253_v3  ;;  %v1311_v9 = vadd.f32 %v1310_v34, %v1309_v16  ;;  %v1367_v25 = vadd.f32 %v1366_v52, %v1365_v53 }
 0x2ad   : > { %v1362_v7 = vadd.f32 %v1361_v1, %v1360_v51  ;;  %v1263_v60 = vrot.slane %v1262_v46, 1  ;;  %v1319_v61 = vrot.slane %v1318_v13, 1  ;;  %v1375_v63 = vrot.slane %v1374_v35, 1 }
 0x2ae   : > { %v1256_v0 = vrot.slane %v1255_v31, 1  ;;  %v1312_v28 = vrot.slane %v1311_v9, 1  ;;  %v1368_v23 = vrot.slane %v1367_v25, 1  ;;  %v1410_v49 = vsel %vm1409_vm15, %v1250_v36, %v1408_v14 }
 0x2af   : > { %vm1411_vm0 = vcmask 1046534   ;;  %v1419_v45 = vsel %vm1409_vm15, %v1306_v10, %v1418_v12  ;;  %v1426_v32 = vsel %vm1409_vm15, %v1362_v7, %v1425_v42  ;;  %vm1413_vm2 = vcmask 1047559  }
 0x2b0   : > { %v1257_v20 = vadd.f32 %v1256_v0, %v1255_v31  ;;  %v1313_v19 = vadd.f32 %v1312_v28, %v1311_v9  ;;  %v1369_v47 = vadd.f32 %v1368_v23, %v1367_v25  ;;  %v1264_v50 = vadd.f32 %v1263_v60, %v1262_v46 }
 0x2b1   : > { %v1320_v43 = vadd.f32 %v1319_v61, %v1318_v13  ;;  %v1376_v39 = vadd.f32 %v1375_v63, %v1374_v35 }
 0x2b2   : > { %v1412_v37 = vsel %vm1411_vm0, %v1257_v20, %v1410_v49  ;;  %v1420_v15 = vsel %vm1411_vm0, %v1313_v19, %v1419_v45  ;;  %v1427_v2 = vsel %vm1411_vm0, %v1369_v47, %v1426_v32 }
 0x2b3   : > { %v1414_v40 = vsel %vm1413_vm2, %v1264_v50, %v1412_v37  ;;  %v1421_v8 = vsel %vm1413_vm2, %v1320_v43, %v1420_v15  ;;  %v1428_v22 = vsel %vm1413_vm2, %v1376_v39, %v1427_v2 }
 0x2b4   : > { %1432 = vst.msk [vmem:[%s201_s3] sm:$0xff] %vm347_vm1, %v1414_v40  ;;  %1433 = vst.msk [vmem:[%s201_s3 + $0x8] sm:$0xff] %vm347_vm1, %v1421_v8 }
 0x2b5   : > { %1434 = vst.msk [vmem:[%s201_s3 + $0x10] sm:$0xff] %vm347_vm1, %v1428_v22 }
 0x2b6   : > { %1797 = shalt.err (!%p1794_p0)
}
 0x2b7   : > { %s1798_s30 = scalar_lea.hbm %s2856_s13, 384  ;;  %s1802_s7 = scalar_lea.hbm %s2906_s2, 768 }
 0x2b8   : > { %p1799_p7 = scmp.ne.s32.totalorder %s2856_s13, %s1798_s30  ;;  %p1803_p9 = scmp.lt.s32.totalorder %s2856_s13, %s2906_s2 }
 0x2b9   : > { %p1804_p6 = scmp.lt.s32.totalorder %s1802_s7, %s1798_s30 }
 0x2ba   : > { %p1800_p3 = pnand %p1799_p7, %p2941_p5 }
 0x2bb   : > { %p1805_p4 = por %p1804_p6, %p1803_p9 }
 0x2bc   : > { %p1801_p8 = pneg %p1800_p3 }
 0x2be   : > { %p1806_p11 = pnand %p1805_p4, %p1801_p8 }
 0x2c0   : > { %1809 = shalt.err (!%p1806_p11)
}
 0x2c1   : > { %s1864_s19 = smov 128   ;;  %s1865_s20 = smov 256  }
 0x2c2   : > { %s1866_s23 = smov 8  }
 0x2c3   : > { %1685 = dma.vmem_to_hbm [thread:$0]  (%p2941_p5), %s2858_s8, 384, %s2856_s13, %s1436_s25, %s1864_s19, %s1865_s20, %s1866_s23  }
 0x2c4 PF: > { %s1463_s3 = sand.u32 1, %s1840_s9   ;;  %p2942_p12 = scmp.ne.s32.totalorder %s2924_s22, 0 }
 0x2c5   : > { %s1464_s16 = scalar_lea.sflag [#allocation4], %s1463_s3 }
 0x2c6   : > { %p1692_p13 = pnand %p1534_p10, %p2942_p12 }
 0x2c8   : > { %p1693_p1 = pneg %p1692_p13 }
 0x2ca   : > { %1835 = dma.done.wait (%p1693_p1), %s1464_s16, 384  }
 0x2cb   : > { %1837 = vsyncadd (%p1693_p1), %s1464_s16, 4294966912  ;;  %p16_p2 = scmp.ge.s32.totalorder %s1907_s15, 4   ;;  %s2943_s9 = smov %s1844_s10 }
 0x2cc   : > { %s2944_s10 = smov %s1848_s11  ;;  %s2945_s11 = smov %s1919_s18 }
 0x2cd   : > { %s2946_s12 = smov %s1907_s15  ;;  %18 = sbr.rel (!%p16_p2) target bundleno = 6 (0x6), region = 82 }
 0x2d2   :  { %1469 = vsyncpa [#allocation3], 1 }
 0x2d3   :  { %1471 = vsyncpa [#allocation3 + $0x1], 1 }
 0x2d4   :  { %1472 = vsyncpa [#allocation6], 1 }
 0x2d5   :  { %1473 = vsyncpa [#allocation4], 1 }
 0x2d6   :  { %1475 = vsyncpa [#allocation4 + $0x1], 1 }

</bundles_post_ra>
